<compile_context>
chip_gen: v7x
topology: tpu7x:2x2x1
jax: 0.10.0
libtpu: 0.0.40
codegen_flags: <defaults>
</compile_context>

<pallas_src>
import functools

import jax
import jax.numpy as jnp
from jax.experimental import pallas as pl
from jax.experimental.pallas import tpu as pltpu


def _round_up(x, m):
    return ((x + m - 1) // m) * m


# ----------------------------------------------------------------------------
# Fused kernel: ConvTranspose2d (stride (1,2)) + CumulativeLayerNorm2d + PReLU
# ----------------------------------------------------------------------------
def _deconv_cln_prelu_kernel(x_ref, w_ref, p_ref, o_ref, carry_ref, *,
                             n_feats, eps, m_chunk):
    """One (batch, time-tile) grid step.

    x_ref     : (1, Kp, TT) bf16  Kp = kT*cin*F_in (taps pre-stacked), time on lanes
    w_ref     : (M, Kp)     bf16  M = co*F_out (freq deconv + taps folded in)
    p_ref     : (M, 4)      f32   columns = [conv bias, LN gain, LN beta, PReLU slope]
    o_ref     : (1, M, TT)  f32   output block (doubles as the f32 staging slab)
    carry_ref : (2, 1)      f32   running cumulative [sum; sum_sq] across time tiles
    """
    M = o_ref.shape[1]
    TT = o_ref.shape[2]
    t_idx = pl.program_id(1)

    @pl.when(t_idx == 0)
    def _():                                  # new batch row -> reset cum-stat carry
        carry_ref[...] = jnp.zeros_like(carry_ref)

    # ---- ConvTranspose2d: ONE aligned MXU matmul store (no per-tap RMW) -----
    o_ref[0] = jnp.dot(w_ref[...], x_ref[0], preferred_element_type=jnp.float32)

    # ---- column statistics sum_m(y), sum_m(y^2), chunked over M -------------
    # (conv bias fused here instead of a broadcast-bias slab store/reload)
    col_sum = jnp.zeros((1, TT), jnp.float32)
    col_pow = jnp.zeros((1, TT), jnp.float32)
    for m0 in range(0, M, m_chunk):
        mc = min(m_chunk, M - m0)
        a = o_ref[0, m0:m0 + mc, :] + p_ref[m0:m0 + mc, 0:1]
        col_sum = col_sum + jnp.sum(a, axis=0, keepdims=True)
        col_pow = col_pow + jnp.sum(a * a, axis=0, keepdims=True)

    # ---- inclusive prefix scan along time, entirely in registers ------------
    stats = jnp.concatenate([col_sum, col_pow], axis=0)          # (2, TT)
    carry_in = carry_ref[...]                                    # (2, 1)
    # carry for the NEXT tile = old carry + this tile's total contribution
    carry_ref[...] = carry_in + jnp.sum(stats, axis=1, keepdims=True)

    lane = jax.lax.broadcasted_iota(jnp.int32, (2, TT), 1)
    shift = 1
    while shift < TT:                  # log-depth Hillis-Steele scan on XLU rolls
        rolled = pltpu.roll(stats, shift=shift, axis=1)
        stats = stats + jnp.where(lane >= shift, rolled, 0.0)
        shift *= 2
    stats = stats + carry_in           # add cumulative total of all previous tiles

    cum_sum = stats[0:1, :]
    cum_pow = stats[1:2, :]
    gt = (t_idx * TT
          + jax.lax.broadcasted_iota(jnp.int32, (1, TT), 1)).astype(jnp.float32)
    inv_cnt = 1.0 / ((gt + 1.0) * n_feats)
    cum_mean = cum_sum * inv_cnt
    cum_var = (cum_pow - 2.0 * cum_mean * cum_sum) * inv_cnt + cum_mean * cum_mean
    cum_var = jnp.maximum(cum_var, 0.0)            # guard against cancellation
    inv_std = jax.lax.rsqrt(cum_var + eps)         # EUP rsqrt, no divide

    # ---- normalize + affine + PReLU, chunked over M (bounded live vregs) ----
    for m0 in range(0, M, m_chunk):
        mc = min(m_chunk, M - m0)
        a = o_ref[0, m0:m0 + mc, :] + p_ref[m0:m0 + mc, 0:1]
        g = p_ref[m0:m0 + mc, 1:2]
        bt = p_ref[m0:m0 + mc, 2:3]
        al = p_ref[m0:m0 + mc, 3:4]
        y = (a - cum_mean) * inv_std
        y = y * g + bt
        o_ref[0, m0:m0 + mc, :] = jnp.where(y >= 0.0, y, al * y)


# ----------------------------------------------------------------------------
# Host-side helpers (layout plumbing, runs once per call under jit)
# ----------------------------------------------------------------------------
def _fold_deconv_weight(w, f_in, f_out, stride_w):
    """Fold the freq-axis transposed conv into a dense matrix per time tap.

    w: (cin, co, kT, kF)  (PyTorch ConvTranspose2d weight layout)
    returns (kT, co*f_out, cin*f_in) with
      out[kt, co*f_out + ow, ci*f_in + iw] = w[ci, co, kt, ow - stride_w*iw]
    (zero where the tap index falls outside [0, kF)).
    """
    cin, co, kT, kF = w.shape
    ow = jnp.arange(f_out)[:, None]
    iw = jnp.arange(f_in)[None, :]
    tap = ow - stride_w * iw
    valid = (tap >= 0) & (tap < kF)
    tap_c = jnp.clip(tap, 0, kF - 1)
    wt = jnp.transpose(w, (2, 1, 0, 3))              # (kT, co, cin, kF)
    gath = wt[:, :, :, tap_c]                        # (kT, co, cin, f_out, f_in)
    gath = jnp.where(valid[None, None, None], gath, 0.0)
    big = jnp.transpose(gath, (0, 1, 3, 2, 4))       # (kT, co, f_out, cin, f_in)
    return big.reshape(kT, co * f_out, cin * f_in)


def deconv2d_unit_forward(x, params, eps=1e-5, time_tile=256):
    """Deconv2dunit forward: x (B, cin, T, F) -> (B, co, T+kT-1, 2*(F-1)+kF)."""
    w, b = params["w"], params["b"]
    gain, beta, alpha = params["gain"], params["beta"], params["alpha"]
    B, cin, T, F = x.shape
    _, co, kT, kF = w.shape
    T_out = T + kT - 1                  # time stride = 1
    F_out = 2 * (F - 1) + kF            # freq stride = 2
    M = co * F_out
    K = cin * F
    Kp = kT * K

    # Time tiling: TT lanes per grid step (>=128, default 256 to fill the MXU),
    # output padded up to a multiple of TT and cropped afterwards.
    TT = min(time_tile, _round_up(T_out, 128))
    T_pad = _round_up(T_out, TT)
    n_t = T_pad // TT

    # Fold freq deconv into one matmul weight and flatten the kT taps into the
    # contraction: w_flat[m, kt*K + k] = w_big[kt, m, k].
    w_big = _fold_deconv_weight(w, F, F_out, 2)                       # (kT, M, K)
    w_flat = jnp.transpose(w_big, (1, 0, 2)).reshape(M, Kp).astype(jnp.bfloat16)

    # x: (B, cin, T, F) -> (B, K, T) with time lane-dense, then stack the kT
    # shifted copies so x_stk[b, kt*K + k, t] = x2[b, k, t - kt] (zero outside).
    x2 = jnp.transpose(x, (0, 1, 3, 2)).reshape(B, K, T)
    shifted = [jnp.pad(x2, ((0, 0), (0, 0), (kt, T_pad - T - kt)))
               for kt in range(kT)]
    x_stk = jnp.concatenate(shifted, axis=1).astype(jnp.bfloat16)     # (B, Kp, T_pad)

    # Pack per-row params into one (M, 4) block: [bias, gain, beta, alpha].
    def tile_rows(p):
        return jnp.repeat(p.reshape(co, 1), F_out, axis=0)
    pk = jnp.concatenate([tile_rows(b), tile_rows(gain),
                          tile_rows(beta), tile_rows(alpha)],
                         axis=1).astype(jnp.float32)                  # (M, 4)

    m_chunk = 128 if TT <= 128 else 64
    kern = functools.partial(_deconv_cln_prelu_kernel,
                             n_feats=float(M), eps=eps, m_chunk=m_chunk)

    cost = pl.CostEstimate(
        flops=int(2 * B * M * Kp * T_pad + 12 * B * M * T_pad),
        transcendentals=int(B * T_pad),
        bytes_accessed=int(x_stk.size * 2 + w_flat.size * 2 + pk.size * 4
                           + B * M * T_pad * 4),
    )

    out = pl.pallas_call(
        kern,
        out_shape=jax.ShapeDtypeStruct((B, M, T_pad), jnp.float32),
        grid=(B, n_t),
        in_specs=[
            pl.BlockSpec((1, Kp, TT), lambda b, t: (b, 0, t)),
            pl.BlockSpec((M, Kp), lambda b, t: (0, 0)),     # grid-constant
            pl.BlockSpec((M, 4), lambda b, t: (0, 0)),      # grid-constant
        ],
        out_specs=pl.BlockSpec((1, M, TT), lambda b, t: (b, 0, t)),
        scratch_shapes=[pltpu.VMEM((2, 1), jnp.float32)],   # cum-stat carry
        compiler_params=pltpu.CompilerParams(
            dimension_semantics=("parallel", "arbitrary")),
        cost_estimate=cost,
    )(x_stk, w_flat, pk)

    out = out[:, :, :T_out]                                  # crop time padding
    # (B, co*F_out, T_out) -> (B, co, T_out, F_out) to match the module's layout.
    return out.reshape(B, co, F_out, T_out).transpose(0, 1, 3, 2)


# ----------------------------------------------------------------------------
# Pure-JAX reference (matches the kernel's bf16 MXU operand precision)
# ----------------------------------------------------------------------------
@jax.jit
def _reference_forward(x, w, b, gain, beta, alpha, eps=1e-5):
    B, cin, T, F = x.shape
    _, co, kT, kF = w.shape
    T_out = T + kT - 1
    F_out = 2 * (F - 1) + kF
    xb = x.astype(jnp.bfloat16).astype(jnp.float32)
    wb = w.astype(jnp.bfloat16).astype(jnp.float32)
    y = jnp.einsum("bctf,cokl->botfkl", xb, wb,
                   precision=jax.lax.Precision.HIGHEST)      # (B,co,T,F,kT,kF)
    out = jnp.zeros((B, co, T_out, F_out), jnp.float32)
    for kt in range(kT):
        for kf in range(kF):
            out = out.at[:, :, kt:kt + T, kf:kf + 2 * (F - 1) + 1:2].add(
                y[..., kt, kf])
    out = out + b.reshape(1, co, 1, 1)
    s = jnp.sum(out, axis=(1, 3), keepdims=True)
    p = jnp.sum(out * out, axis=(1, 3), keepdims=True)
    cs = jnp.cumsum(s, axis=2)
    cp = jnp.cumsum(p, axis=2)
    cnt = (jnp.arange(1, T_out + 1, dtype=jnp.float32)
           * co * F_out).reshape(1, 1, T_out, 1)
    mean = cs / cnt
    var = (cp - 2.0 * mean * cs) / cnt + mean * mean
    std = jnp.sqrt(var + eps)
    z = (out - mean) / std
    z = z * gain.reshape(1, co, 1, 1) + beta.reshape(1, co, 1, 1)
    return jnp.where(z >= 0, z, alpha.reshape(1, co, 1, 1) * z)


if __name__ == "__main__":
    # Deconv2dunit(k=(1, 3), c=16, intra_connect='cat') ->
    #   ConvTranspose2d(2*c, c, (1, 3), stride=(1, 2))
    #   + CumulativeLayerNorm2d(c, affine=True) + PReLU(c)
    kT, kF = 1, 3
    c = 16
    cin = 2 * c                       # intra_connect == 'cat'
    B, T, F = 2, 128, 8               # (B, C, T, F) input; time kept lane-dense

    key = jax.random.PRNGKey(0)
    kx, kw, kb, kg, kbt = jax.random.split(key, 5)
    x = jax.random.normal(kx, (B, cin, T, F), jnp.float32)
    params = {
        "w": 0.1 * jax.random.normal(kw, (cin, c, kT, kF), jnp.float32),
        "b": 0.1 * jax.random.normal(kb, (c,), jnp.float32),
        "gain": 1.0 + 0.1 * jax.random.normal(kg, (c,), jnp.float32),
        "beta": 0.1 * jax.random.normal(kbt, (c,), jnp.float32),
        "alpha": 0.25 * jnp.ones((c,), jnp.float32),   # PReLU default slope
    }

    fwd = jax.jit(deconv2d_unit_forward)
    out = jax.block_until_ready(fwd(x, params))

    T_out, F_out = T + kT - 1, 2 * (F - 1) + kF
    assert out.shape == (B, c, T_out, F_out), out.shape
    assert bool(jnp.all(jnp.isfinite(out)))

    ref = _reference_forward(x, params["w"], params["b"], params["gain"],
                             params["beta"], params["alpha"])
    max_err = float(jnp.max(jnp.abs(out - ref)))
    assert max_err < 2e-2, f"max abs error vs reference: {max_err}"
    print("KERNEL_OK")
</pallas_src>

<mosaic_0001>
module attributes {stable_mosaic.version = 11 : i64} {
  func.func @_deconv_cln_prelu_kernel(%arg0: i32, %arg1: i32, %arg2: memref<1x256x128xbf16, #tpu.memory_space<vmem>>, %arg3: memref<272x256xbf16, #tpu.memory_space<vmem>>, %arg4: memref<272x4xf32, #tpu.memory_space<vmem>>, %arg5: memref<1x272x128xf32, #tpu.memory_space<vmem>>, %arg6: memref<2x1xf32, #tpu.memory_space<vmem>>) attributes {dimension_semantics = [#tpu.dimension_semantics<parallel>, #tpu.dimension_semantics<arbitrary>], iteration_bounds = array<i64: 2, 1>, scalar_prefetch = 0 : i64, scratch_operands = 1 : i64, tpu.core_type = #tpu.core_type<tc>, window_params = [{transform_indices = @transform_0, window_bounds = array<i64: 1, 256, 128>}, {pipeline_mode = #tpu.pipeline_mode<synchronous>, transform_indices = @transform_1, window_bounds = array<i64: 272, 256>}, {pipeline_mode = #tpu.pipeline_mode<synchronous>, transform_indices = @transform_2, window_bounds = array<i64: 272, 4>}, {transform_indices = @transform_3, window_bounds = array<i64: 1, 272, 128>}]} {
    %c0_i32 = arith.constant 0 : i32
    %0 = arith.cmpi eq, %arg1, %c0_i32 : i32
    %1 = arith.extui %0 : i1 to i32
    %c0_i32_0 = arith.constant 0 : i32
    %2 = arith.cmpi ne, %1, %c0_i32_0 : i32
    scf.if %2 {
      %cst_96 = arith.constant 0.000000e+00 : f32
      %197 = vector.broadcast %cst_96 : f32 to vector<2x1xf32>
      %c0_97 = arith.constant 0 : index
      %c0_98 = arith.constant 0 : index
      %198 = vector.load %arg6[%c0_97, %c0_98] : memref<2x1xf32, #tpu.memory_space<vmem>>, vector<2x1xf32>
      tpu.vector_store %arg6[%c0_97, %c0_98], %197 {strides = array<i32>} : memref<2x1xf32, #tpu.memory_space<vmem>>, vector<2x1xf32>,
    } else {
    }
    %c0 = arith.constant 0 : index
    %c0_1 = arith.constant 0 : index
    %3 = vector.load %arg3[%c0, %c0_1] : memref<272x256xbf16, #tpu.memory_space<vmem>>, vector<272x256xbf16>
    %c0_2 = arith.constant 0 : index
    %c0_3 = arith.constant 0 : index
    %c0_4 = arith.constant 0 : index
    %4 = vector.load %arg2[%c0_2, %c0_3, %c0_4] : memref<1x256x128xbf16, #tpu.memory_space<vmem>>, vector<1x256x128xbf16>
    %5 = vector.shape_cast %4 : vector<1x256x128xbf16> to vector<256x128xbf16>
    %cst = arith.constant dense<0.000000e+00> : vector<272x128xf32>
    %6 = tpu.matmul %3, %5, %cst {dimension_numbers = #tpu.dot_dimension_numbers<[1], [0], [0], [1], [0, 0, 1, 1], [], []>} : vector<272x256xbf16>, vector<256x128xbf16>, vector<272x128xf32> -> vector<272x128xf32>
    %c0_5 = arith.constant 0 : index
    %c0_6 = arith.constant 0 : index
    %c0_7 = arith.constant 0 : index
    %7 = vector.load %arg5[%c0_5, %c0_6, %c0_7] : memref<1x272x128xf32, #tpu.memory_space<vmem>>, vector<1x272x128xf32>
    %8 = vector.shape_cast %7 : vector<1x272x128xf32> to vector<272x128xf32>
    %9 = vector.shape_cast %6 : vector<272x128xf32> to vector<1x272x128xf32>
    tpu.vector_store %arg5[%c0_5, %c0_6, %c0_7], %9 {strides = array<i32>} : memref<1x272x128xf32, #tpu.memory_space<vmem>>, vector<1x272x128xf32>,
    %cst_8 = arith.constant 0.000000e+00 : f32
    %10 = vector.broadcast %cst_8 : f32 to vector<1x128xf32>
    %cst_9 = arith.constant 0.000000e+00 : f32
    %11 = vector.broadcast %cst_9 : f32 to vector<1x128xf32>
    %c0_10 = arith.constant 0 : index
    %c0_11 = arith.constant 0 : index
    %c0_12 = arith.constant 0 : index
    %12 = vector.load %arg5[%c0_10, %c0_11, %c0_12] : memref<1x272x128xf32, #tpu.memory_space<vmem>>, vector<1x128x128xf32>
    %13 = vector.shape_cast %12 : vector<1x128x128xf32> to vector<128x128xf32>
    %c0_13 = arith.constant 0 : index
    %c0_14 = arith.constant 0 : index
    %14 = vector.load %arg4[%c0_13, %c0_14] : memref<272x4xf32, #tpu.memory_space<vmem>>, vector<128x1xf32>
    %15 = vector.broadcast %14 : vector<128x1xf32> to vector<128x128xf32>
    %16 = arith.addf %13, %15 : vector<128x128xf32>
    %cst_15 = arith.constant dense<0.000000e+00> : vector<128xf32>
    %17 = vector.multi_reduction <add>, %16, %cst_15 [0] : vector<128x128xf32> to vector<128xf32>
    %18 = vector.shape_cast %17 : vector<128xf32> to vector<1x128xf32>
    %19 = arith.addf %10, %18 : vector<1x128xf32>
    %20 = arith.mulf %16, %16 : vector<128x128xf32>
    %cst_16 = arith.constant dense<0.000000e+00> : vector<128xf32>
    %21 = vector.multi_reduction <add>, %20, %cst_16 [0] : vector<128x128xf32> to vector<128xf32>
    %22 = vector.shape_cast %21 : vector<128xf32> to vector<1x128xf32>
    %23 = arith.addf %11, %22 : vector<1x128xf32>
    %c0_17 = arith.constant 0 : index
    %c128 = arith.constant 128 : index
    %c0_18 = arith.constant 0 : index
    %24 = vector.load %arg5[%c0_17, %c128, %c0_18] : memref<1x272x128xf32, #tpu.memory_space<vmem>>, vector<1x128x128xf32>
    %25 = vector.shape_cast %24 : vector<1x128x128xf32> to vector<128x128xf32>
    %c128_19 = arith.constant 128 : index
    %c0_20 = arith.constant 0 : index
    %26 = vector.load %arg4[%c128_19, %c0_20] : memref<272x4xf32, #tpu.memory_space<vmem>>, vector<128x1xf32>
    %27 = vector.broadcast %26 : vector<128x1xf32> to vector<128x128xf32>
    %28 = arith.addf %25, %27 : vector<128x128xf32>
    %cst_21 = arith.constant dense<0.000000e+00> : vector<128xf32>
    %29 = vector.multi_reduction <add>, %28, %cst_21 [0] : vector<128x128xf32> to vector<128xf32>
    %30 = vector.shape_cast %29 : vector<128xf32> to vector<1x128xf32>
    %31 = arith.addf %19, %30 : vector<1x128xf32>
    %32 = arith.mulf %28, %28 : vector<128x128xf32>
    %cst_22 = arith.constant dense<0.000000e+00> : vector<128xf32>
    %33 = vector.multi_reduction <add>, %32, %cst_22 [0] : vector<128x128xf32> to vector<128xf32>
    %34 = vector.shape_cast %33 : vector<128xf32> to vector<1x128xf32>
    %35 = arith.addf %23, %34 : vector<1x128xf32>
    %c0_23 = arith.constant 0 : index
    %c256 = arith.constant 256 : index
    %c0_24 = arith.constant 0 : index
    %36 = vector.load %arg5[%c0_23, %c256, %c0_24] : memref<1x272x128xf32, #tpu.memory_space<vmem>>, vector<1x16x128xf32>
    %37 = vector.shape_cast %36 : vector<1x16x128xf32> to vector<16x128xf32>
    %c256_25 = arith.constant 256 : index
    %c0_26 = arith.constant 0 : index
    %38 = vector.load %arg4[%c256_25, %c0_26] : memref<272x4xf32, #tpu.memory_space<vmem>>, vector<16x1xf32>
    %39 = vector.broadcast %38 : vector<16x1xf32> to vector<16x128xf32>
    %40 = arith.addf %37, %39 : vector<16x128xf32>
    %cst_27 = arith.constant dense<0.000000e+00> : vector<128xf32>
    %41 = vector.multi_reduction <add>, %40, %cst_27 [0] : vector<16x128xf32> to vector<128xf32>
    %42 = vector.shape_cast %41 : vector<128xf32> to vector<1x128xf32>
    %43 = arith.addf %31, %42 : vector<1x128xf32>
    %44 = arith.mulf %40, %40 : vector<16x128xf32>
    %cst_28 = arith.constant dense<0.000000e+00> : vector<128xf32>
    %45 = vector.multi_reduction <add>, %44, %cst_28 [0] : vector<16x128xf32> to vector<128xf32>
    %46 = vector.shape_cast %45 : vector<128xf32> to vector<1x128xf32>
    %47 = arith.addf %35, %46 : vector<1x128xf32>
    %48 = tpu.concatenate %43, %47 in 0 : vector<1x128xf32>, vector<1x128xf32> -> vector<2x128xf32>
    %c0_29 = arith.constant 0 : index
    %c0_30 = arith.constant 0 : index
    %49 = vector.load %arg6[%c0_29, %c0_30] : memref<2x1xf32, #tpu.memory_space<vmem>>, vector<2x1xf32>
    %cst_31 = arith.constant dense<0.000000e+00> : vector<2xf32>
    %50 = vector.multi_reduction <add>, %48, %cst_31 [1] : vector<2x128xf32> to vector<2xf32>
    %51 = vector.shape_cast %50 : vector<2xf32> to vector<2x1xf32>
    %52 = arith.addf %49, %51 : vector<2x1xf32>
    %c0_32 = arith.constant 0 : index
    %c0_33 = arith.constant 0 : index
    %53 = vector.load %arg6[%c0_32, %c0_33] : memref<2x1xf32, #tpu.memory_space<vmem>>, vector<2x1xf32>
    tpu.vector_store %arg6[%c0_32, %c0_33], %52 {strides = array<i32>} : memref<2x1xf32, #tpu.memory_space<vmem>>, vector<2x1xf32>,
    %54 = tpu.iota {dimensions = array<i32: 1>} : vector<2x128xi32>
    %c1_i32 = arith.constant 1 : i32
    %55 = tpu.dynamic_rotate %48 by %c1_i32 dim 1 : vector<2x128xf32>, i32 -> vector<2x128xf32>
    %c1_i32_34 = arith.constant 1 : i32
    %56 = vector.broadcast %c1_i32_34 : i32 to vector<2x128xi32>
    %57 = arith.cmpi sge, %54, %56 : vector<2x128xi32>
    %cst_35 = arith.constant 0.000000e+00 : f32
    %58 = vector.broadcast %cst_35 : f32 to vector<2x128xf32>
    %59 = arith.select %57, %55, %58 : vector<2x128xi1>, vector<2x128xf32>
    %60 = arith.addf %48, %59 : vector<2x128xf32>
    %c2_i32 = arith.constant 2 : i32
    %61 = tpu.dynamic_rotate %60 by %c2_i32 dim 1 : vector<2x128xf32>, i32 -> vector<2x128xf32>
    %c2_i32_36 = arith.constant 2 : i32
    %62 = vector.broadcast %c2_i32_36 : i32 to vector<2x128xi32>
    %63 = arith.cmpi sge, %54, %62 : vector<2x128xi32>
    %cst_37 = arith.constant 0.000000e+00 : f32
    %64 = vector.broadcast %cst_37 : f32 to vector<2x128xf32>
    %65 = arith.select %63, %61, %64 : vector<2x128xi1>, vector<2x128xf32>
    %66 = arith.addf %60, %65 : vector<2x128xf32>
    %c4_i32 = arith.constant 4 : i32
    %67 = tpu.dynamic_rotate %66 by %c4_i32 dim 1 : vector<2x128xf32>, i32 -> vector<2x128xf32>
    %c4_i32_38 = arith.constant 4 : i32
    %68 = vector.broadcast %c4_i32_38 : i32 to vector<2x128xi32>
    %69 = arith.cmpi sge, %54, %68 : vector<2x128xi32>
    %cst_39 = arith.constant 0.000000e+00 : f32
    %70 = vector.broadcast %cst_39 : f32 to vector<2x128xf32>
    %71 = arith.select %69, %67, %70 : vector<2x128xi1>, vector<2x128xf32>
    %72 = arith.addf %66, %71 : vector<2x128xf32>
    %c8_i32 = arith.constant 8 : i32
    %73 = tpu.dynamic_rotate %72 by %c8_i32 dim 1 : vector<2x128xf32>, i32 -> vector<2x128xf32>
    %c8_i32_40 = arith.constant 8 : i32
    %74 = vector.broadcast %c8_i32_40 : i32 to vector<2x128xi32>
    %75 = arith.cmpi sge, %54, %74 : vector<2x128xi32>
    %cst_41 = arith.constant 0.000000e+00 : f32
    %76 = vector.broadcast %cst_41 : f32 to vector<2x128xf32>
    %77 = arith.select %75, %73, %76 : vector<2x128xi1>, vector<2x128xf32>
    %78 = arith.addf %72, %77 : vector<2x128xf32>
    %c16_i32 = arith.constant 16 : i32
    %79 = tpu.dynamic_rotate %78 by %c16_i32 dim 1 : vector<2x128xf32>, i32 -> vector<2x128xf32>
    %c16_i32_42 = arith.constant 16 : i32
    %80 = vector.broadcast %c16_i32_42 : i32 to vector<2x128xi32>
    %81 = arith.cmpi sge, %54, %80 : vector<2x128xi32>
    %cst_43 = arith.constant 0.000000e+00 : f32
    %82 = vector.broadcast %cst_43 : f32 to vector<2x128xf32>
    %83 = arith.select %81, %79, %82 : vector<2x128xi1>, vector<2x128xf32>
    %84 = arith.addf %78, %83 : vector<2x128xf32>
    %c32_i32 = arith.constant 32 : i32
    %85 = tpu.dynamic_rotate %84 by %c32_i32 dim 1 : vector<2x128xf32>, i32 -> vector<2x128xf32>
    %c32_i32_44 = arith.constant 32 : i32
    %86 = vector.broadcast %c32_i32_44 : i32 to vector<2x128xi32>
    %87 = arith.cmpi sge, %54, %86 : vector<2x128xi32>
    %cst_45 = arith.constant 0.000000e+00 : f32
    %88 = vector.broadcast %cst_45 : f32 to vector<2x128xf32>
    %89 = arith.select %87, %85, %88 : vector<2x128xi1>, vector<2x128xf32>
    %90 = arith.addf %84, %89 : vector<2x128xf32>
    %c64_i32 = arith.constant 64 : i32
    %91 = tpu.dynamic_rotate %90 by %c64_i32 dim 1 : vector<2x128xf32>, i32 -> vector<2x128xf32>
    %c64_i32_46 = arith.constant 64 : i32
    %92 = vector.broadcast %c64_i32_46 : i32 to vector<2x128xi32>
    %93 = arith.cmpi sge, %54, %92 : vector<2x128xi32>
    %cst_47 = arith.constant 0.000000e+00 : f32
    %94 = vector.broadcast %cst_47 : f32 to vector<2x128xf32>
    %95 = arith.select %93, %91, %94 : vector<2x128xi1>, vector<2x128xf32>
    %96 = arith.addf %90, %95 : vector<2x128xf32>
    %97 = vector.broadcast %49 : vector<2x1xf32> to vector<2x128xf32>
    %98 = arith.addf %96, %97 : vector<2x128xf32>
    %99 = vector.extract_strided_slice %98 {offsets = [0, 0], sizes = [1, 128], strides = [1, 1]} : vector<2x128xf32> to vector<1x128xf32>
    %100 = vector.extract_strided_slice %98 {offsets = [1, 0], sizes = [1, 128], strides = [1, 1]} : vector<2x128xf32> to vector<1x128xf32>
    %c128_i32 = arith.constant 128 : i32
    %101 = arith.muli %arg1, %c128_i32 : i32
    %102 = tpu.iota {dimensions = array<i32: 1>} : vector<1x128xi32>
    %103 = vector.broadcast %101 : i32 to vector<1x128xi32>
    %104 = arith.addi %103, %102 : vector<1x128xi32>
    %105 = arith.sitofp %104 : vector<1x128xi32> to vector<1x128xf32>
    %cst_48 = arith.constant 1.000000e+00 : f32
    %106 = vector.broadcast %cst_48 : f32 to vector<1x128xf32>
    %107 = arith.addf %105, %106 : vector<1x128xf32>
    %cst_49 = arith.constant 2.720000e+02 : f32
    %108 = vector.broadcast %cst_49 : f32 to vector<1x128xf32>
    %109 = arith.mulf %107, %108 : vector<1x128xf32>
    %cst_50 = arith.constant 1.000000e+00 : f32
    %110 = vector.broadcast %cst_50 : f32 to vector<1x128xf32>
    %111 = arith.divf %110, %109 : vector<1x128xf32>
    %112 = arith.mulf %99, %111 : vector<1x128xf32>
    %cst_51 = arith.constant 2.000000e+00 : f32
    %113 = vector.broadcast %cst_51 : f32 to vector<1x128xf32>
    %114 = arith.mulf %113, %112 : vector<1x128xf32>
    %115 = arith.mulf %114, %99 : vector<1x128xf32>
    %116 = arith.subf %100, %115 : vector<1x128xf32>
    %117 = arith.mulf %116, %111 : vector<1x128xf32>
    %118 = arith.mulf %112, %112 : vector<1x128xf32>
    %119 = arith.addf %117, %118 : vector<1x128xf32>
    %cst_52 = arith.constant 0.000000e+00 : f32
    %120 = vector.broadcast %cst_52 : f32 to vector<1x128xf32>
    %121 = arith.maximumf %119, %120 : vector<1x128xf32>
    %cst_53 = arith.constant 9.99999974E-6 : f32
    %122 = vector.broadcast %cst_53 : f32 to vector<1x128xf32>
    %123 = arith.addf %121, %122 : vector<1x128xf32>
    %124 = math.rsqrt %123 : vector<1x128xf32>
    %c0_54 = arith.constant 0 : index
    %c0_55 = arith.constant 0 : index
    %c0_56 = arith.constant 0 : index
    %125 = vector.load %arg5[%c0_54, %c0_55, %c0_56] : memref<1x272x128xf32, #tpu.memory_space<vmem>>, vector<1x128x128xf32>
    %126 = vector.shape_cast %125 : vector<1x128x128xf32> to vector<128x128xf32>
    %c0_57 = arith.constant 0 : index
    %c0_58 = arith.constant 0 : index
    %127 = vector.load %arg4[%c0_57, %c0_58] : memref<272x4xf32, #tpu.memory_space<vmem>>, vector<128x1xf32>
    %128 = vector.broadcast %127 : vector<128x1xf32> to vector<128x128xf32>
    %129 = arith.addf %126, %128 : vector<128x128xf32>
    %c0_59 = arith.constant 0 : index
    %c1 = arith.constant 1 : index
    %130 = vector.load %arg4[%c0_59, %c1] : memref<272x4xf32, #tpu.memory_space<vmem>>, vector<128x1xf32>
    %c0_60 = arith.constant 0 : index
    %c2 = arith.constant 2 : index
    %131 = vector.load %arg4[%c0_60, %c2] : memref<272x4xf32, #tpu.memory_space<vmem>>, vector<128x1xf32>
    %c0_61 = arith.constant 0 : index
    %c3 = arith.constant 3 : index
    %132 = vector.load %arg4[%c0_61, %c3] : memref<272x4xf32, #tpu.memory_space<vmem>>, vector<128x1xf32>
    %133 = vector.broadcast %112 : vector<1x128xf32> to vector<128x128xf32>
    %134 = arith.subf %129, %133 : vector<128x128xf32>
    %135 = vector.broadcast %124 : vector<1x128xf32> to vector<128x128xf32>
    %136 = arith.mulf %134, %135 : vector<128x128xf32>
    %137 = vector.broadcast %130 : vector<128x1xf32> to vector<128x128xf32>
    %138 = arith.mulf %136, %137 : vector<128x128xf32>
    %139 = vector.broadcast %131 : vector<128x1xf32> to vector<128x128xf32>
    %140 = arith.addf %138, %139 : vector<128x128xf32>
    %cst_62 = arith.constant 0.000000e+00 : f32
    %141 = vector.broadcast %cst_62 : f32 to vector<128x128xf32>
    %142 = arith.cmpf oge, %140, %141 : vector<128x128xf32>
    %143 = vector.broadcast %132 : vector<128x1xf32> to vector<128x128xf32>
    %144 = arith.mulf %143, %140 : vector<128x128xf32>
    %145 = arith.select %142, %140, %144 : vector<128x128xi1>, vector<128x128xf32>
    %c0_63 = arith.constant 0 : index
    %c0_64 = arith.constant 0 : index
    %c0_65 = arith.constant 0 : index
    %146 = vector.load %arg5[%c0_63, %c0_64, %c0_65] : memref<1x272x128xf32, #tpu.memory_space<vmem>>, vector<1x128x128xf32>
    %147 = vector.shape_cast %146 : vector<1x128x128xf32> to vector<128x128xf32>
    %148 = vector.shape_cast %145 : vector<128x128xf32> to vector<1x128x128xf32>
    tpu.vector_store %arg5[%c0_63, %c0_64, %c0_65], %148 {strides = array<i32>} : memref<1x272x128xf32, #tpu.memory_space<vmem>>, vector<1x128x128xf32>,
    %c0_66 = arith.constant 0 : index
    %c128_67 = arith.constant 128 : index
    %c0_68 = arith.constant 0 : index
    %149 = vector.load %arg5[%c0_66, %c128_67, %c0_68] : memref<1x272x128xf32, #tpu.memory_space<vmem>>, vector<1x128x128xf32>
    %150 = vector.shape_cast %149 : vector<1x128x128xf32> to vector<128x128xf32>
    %c128_69 = arith.constant 128 : index
    %c0_70 = arith.constant 0 : index
    %151 = vector.load %arg4[%c128_69, %c0_70] : memref<272x4xf32, #tpu.memory_space<vmem>>, vector<128x1xf32>
    %152 = vector.broadcast %151 : vector<128x1xf32> to vector<128x128xf32>
    %153 = arith.addf %150, %152 : vector<128x128xf32>
    %c128_71 = arith.constant 128 : index
    %c1_72 = arith.constant 1 : index
    %154 = vector.load %arg4[%c128_71, %c1_72] : memref<272x4xf32, #tpu.memory_space<vmem>>, vector<128x1xf32>
    %c128_73 = arith.constant 128 : index
    %c2_74 = arith.constant 2 : index
    %155 = vector.load %arg4[%c128_73, %c2_74] : memref<272x4xf32, #tpu.memory_space<vmem>>, vector<128x1xf32>
    %c128_75 = arith.constant 128 : index
    %c3_76 = arith.constant 3 : index
    %156 = vector.load %arg4[%c128_75, %c3_76] : memref<272x4xf32, #tpu.memory_space<vmem>>, vector<128x1xf32>
    %157 = vector.broadcast %112 : vector<1x128xf32> to vector<128x128xf32>
    %158 = arith.subf %153, %157 : vector<128x128xf32>
    %159 = vector.broadcast %124 : vector<1x128xf32> to vector<128x128xf32>
    %160 = arith.mulf %158, %159 : vector<128x128xf32>
    %161 = vector.broadcast %154 : vector<128x1xf32> to vector<128x128xf32>
    %162 = arith.mulf %160, %161 : vector<128x128xf32>
    %163 = vector.broadcast %155 : vector<128x1xf32> to vector<128x128xf32>
    %164 = arith.addf %162, %163 : vector<128x128xf32>
    %cst_77 = arith.constant 0.000000e+00 : f32
    %165 = vector.broadcast %cst_77 : f32 to vector<128x128xf32>
    %166 = arith.cmpf oge, %164, %165 : vector<128x128xf32>
    %167 = vector.broadcast %156 : vector<128x1xf32> to vector<128x128xf32>
    %168 = arith.mulf %167, %164 : vector<128x128xf32>
    %169 = arith.select %166, %164, %168 : vector<128x128xi1>, vector<128x128xf32>
    %c0_78 = arith.constant 0 : index
    %c128_79 = arith.constant 128 : index
    %c0_80 = arith.constant 0 : index
    %170 = vector.load %arg5[%c0_78, %c128_79, %c0_80] : memref<1x272x128xf32, #tpu.memory_space<vmem>>, vector<1x128x128xf32>
    %171 = vector.shape_cast %170 : vector<1x128x128xf32> to vector<128x128xf32>
    %172 = vector.shape_cast %169 : vector<128x128xf32> to vector<1x128x128xf32>
    tpu.vector_store %arg5[%c0_78, %c128_79, %c0_80], %172 {strides = array<i32>} : memref<1x272x128xf32, #tpu.memory_space<vmem>>, vector<1x128x128xf32>,
    %c0_81 = arith.constant 0 : index
    %c256_82 = arith.constant 256 : index
    %c0_83 = arith.constant 0 : index
    %173 = vector.load %arg5[%c0_81, %c256_82, %c0_83] : memref<1x272x128xf32, #tpu.memory_space<vmem>>, vector<1x16x128xf32>
    %174 = vector.shape_cast %173 : vector<1x16x128xf32> to vector<16x128xf32>
    %c256_84 = arith.constant 256 : index
    %c0_85 = arith.constant 0 : index
    %175 = vector.load %arg4[%c256_84, %c0_85] : memref<272x4xf32, #tpu.memory_space<vmem>>, vector<16x1xf32>
    %176 = vector.broadcast %175 : vector<16x1xf32> to vector<16x128xf32>
    %177 = arith.addf %174, %176 : vector<16x128xf32>
    %c256_86 = arith.constant 256 : index
    %c1_87 = arith.constant 1 : index
    %178 = vector.load %arg4[%c256_86, %c1_87] : memref<272x4xf32, #tpu.memory_space<vmem>>, vector<16x1xf32>
    %c256_88 = arith.constant 256 : index
    %c2_89 = arith.constant 2 : index
    %179 = vector.load %arg4[%c256_88, %c2_89] : memref<272x4xf32, #tpu.memory_space<vmem>>, vector<16x1xf32>
    %c256_90 = arith.constant 256 : index
    %c3_91 = arith.constant 3 : index
    %180 = vector.load %arg4[%c256_90, %c3_91] : memref<272x4xf32, #tpu.memory_space<vmem>>, vector<16x1xf32>
    %181 = vector.broadcast %112 : vector<1x128xf32> to vector<16x128xf32>
    %182 = arith.subf %177, %181 : vector<16x128xf32>
    %183 = vector.broadcast %124 : vector<1x128xf32> to vector<16x128xf32>
    %184 = arith.mulf %182, %183 : vector<16x128xf32>
    %185 = vector.broadcast %178 : vector<16x1xf32> to vector<16x128xf32>
    %186 = arith.mulf %184, %185 : vector<16x128xf32>
    %187 = vector.broadcast %179 : vector<16x1xf32> to vector<16x128xf32>
    %188 = arith.addf %186, %187 : vector<16x128xf32>
    %cst_92 = arith.constant 0.000000e+00 : f32
    %189 = vector.broadcast %cst_92 : f32 to vector<16x128xf32>
    %190 = arith.cmpf oge, %188, %189 : vector<16x128xf32>
    %191 = vector.broadcast %180 : vector<16x1xf32> to vector<16x128xf32>
    %192 = arith.mulf %191, %188 : vector<16x128xf32>
    %193 = arith.select %190, %188, %192 : vector<16x128xi1>, vector<16x128xf32>
    %c0_93 = arith.constant 0 : index
    %c256_94 = arith.constant 256 : index
    %c0_95 = arith.constant 0 : index
    %194 = vector.load %arg5[%c0_93, %c256_94, %c0_95] : memref<1x272x128xf32, #tpu.memory_space<vmem>>, vector<1x16x128xf32>
    %195 = vector.shape_cast %194 : vector<1x16x128xf32> to vector<16x128xf32>
    %196 = vector.shape_cast %193 : vector<16x128xf32> to vector<1x16x128xf32>
    tpu.vector_store %arg5[%c0_93, %c256_94, %c0_95], %196 {strides = array<i32>} : memref<1x272x128xf32, #tpu.memory_space<vmem>>, vector<1x16x128xf32>,
    return
  }
  func.func @transform_0(%arg0: i32, %arg1: i32) -> (i32, i32, i32) {
    %c0_i32 = arith.constant 0 : i32
    %c0_i32_0 = arith.constant 0 : i32
    return %arg0, %c0_i32, %arg1 : i32, i32, i32
  }
  func.func @transform_1(%arg0: i32, %arg1: i32) -> (i32, i32) {
    %c0_i32 = arith.constant 0 : i32
    %c0_i32_0 = arith.constant 0 : i32
    %c0_i32_1 = arith.constant 0 : i32
    return %c0_i32, %c0_i32_0 : i32, i32
  }
  func.func @transform_2(%arg0: i32, %arg1: i32) -> (i32, i32) {
    %c0_i32 = arith.constant 0 : i32
    %c0_i32_0 = arith.constant 0 : i32
    %c0_i32_1 = arith.constant 0 : i32
    return %c0_i32, %c0_i32_0 : i32, i32
  }
  func.func @transform_3(%arg0: i32, %arg1: i32) -> (i32, i32, i32) {
    %c0_i32 = arith.constant 0 : i32
    %c0_i32_0 = arith.constant 0 : i32
    return %arg0, %c0_i32, %arg1 : i32, i32, i32
  }
}

</mosaic_0001>

<bundles_post_ra>
// kernel: deconv2d_unit_forward.1
= control target key start
LH: loop header
LB: loop body
LE: loop exit
PB: predicated region body
PF: predicated region fallthrough
CT: control target
= control target key end

     0   :  { %s2580_s12 = smov 0   ;;  %s2582_s13 = smov 0   ;;  %s4141_s0 = inlined_call_operand.vmem [shape: bf16[2,256,128], index: 0, kind: input, shape index: {}]   ;;  %s4142_s1 = inlined_call_operand.vmem [shape: bf16[272,256], index: 1, kind: input, shape index: {}]   ;;  %s4143_s2 = inlined_call_operand.vmem [shape: f32[272,4], index: 2, kind: input, shape index: {}]   ;;  %s4144_s3 = inlined_call_operand.vmem [shape: f32[2,272,128], index: 3, kind: output, shape index: {}]  }
   0x1   :  { %s2584_s14 = smov 0  }
   0x2 LB: > { %s25_s15 = sadd.s32 1, %s2542_s13  ;;  %p2278_p0 = scmp.ge.s32.totalorder %s2546_s14, 1  ;;  %s2546_s14 = sphi %s2584_s14, %s13_s14   ;;  %s2542_s13 = sphi %s2582_s13, %s4451_s13   ;;  %s2538_s12 = sphi %s2580_s12, %s4450_s12  }
   0x3   : > { %p27_p1 = scmp.ge.s32.totalorder %s25_s15, 2  ;;  %p156_p2 = scmp.lt.s32.totalorder %s2546_s14, 3 }
   0x5   : > { %s4453_s15 = smov (%p27_p1, %s25_s15), 0  ;;  %p157_p3 = pnand %p2278_p0, %p156_p2 }
   0x7   : > { %160 = sbr.rel (%p157_p3) target bundleno = 1331 (0x533), region = 32 }
   0xe   : > { %p186_p4 = scmp.lt.s32.totalorder %s2538_s12, 1  ;;  %v4147_v0 = vmov 0   ;;  %v2439_v1 = vld [vmem:[%s4142_s1 + $0x4] ss:$8 sps:$4 sm:$0xff]   ;;  %v2442_v2 = vld [vmem:[%s4142_s1 + $0x94] ss:$8 sps:$4 sm:$0xff]  }
   0xf   : > { %541 = vmatprep.subr.bf16.mxu0 %v4147_v0  ;;  %2335 = vmatprep.subr.bf16.mxu1 %v4147_v0  ;;  %v2644_v12 = vld [vmem:[%s4143_s2 + $0x10] sm:$0xff]  ;;  %v2649_v13 = vld [vmem:[%s4143_s2] sm:$0xff]  ;;  %v2656_v14 = vld [vmem:[%s4143_s2 + $0x18] sm:$0xff]  ;;  %vm207_vm0 = vcmask 1024   ;;  %vm1154_vm1 = vcmask 1040384   ;;  %vm1157_vm2 = vcmask 1041408  }
  0x10   : > { %s4455_s12 = smov (!%p186_p4, %s2538_s12), 1  ;;  %2405 = vset.pattern.permute.xlu1 %v4147_v0  ;;  %2404 = vset.pattern.permute.xlu0 %v4147_v0  ;;  %4205 = vst [vmem:[#allocation3_spill] sm:$0xff] %v2644_v12  ;;  %4206 = vst [vmem:[#allocation4_spill] sm:$0xff] %v2649_v13  ;;  %v2661_v15 = vld [vmem:[%s4143_s2 + $0x8] sm:$0xff]  ;;  %v2676_v18 = vld [vmem:[%s4143_s2 + $0x20] sm:$0xff]  ;;  %s2552_s22 = smov 2  }
  0x11   : > { %573 = vmatprep.mubr.bf16.mxu0 %v2439_v1  ;;  %s2334_s20 = sshll.u32 %s4455_s12, 7  ;;  %645 = vmatprep.mubr.bf16.mxu1 %v2442_v2  ;;  %4207 = vst [vmem:[#allocation5_spill] sm:$0xff] %v2656_v14  ;;  %v2671_v17 = vld [vmem:[%s4143_s2 + $0x28] sm:$0xff]  ;;  %v2686_v20 = vld [vmem:[%s4143_s2 + $0x38] sm:$0xff]  ;;  %v2691_v21 = vld [vmem:[%s4143_s2 + $0x30] sm:$0xff]  ;;  %s2367_s18 = smul.u32 272, %s4455_s12 }
  0x12   : > { %s2614_s23 = scalar_lea.vmem %s4141_s0, %s2334_s20  ;;  %788 = vperm.xlu1 %2405, %v2644_v12   ;;  %778 = vperm.xlu0 %2404, %v2649_v13   ;;  %4208 = vst [vmem:[#allocation6_spill] sm:$0xff] %v2671_v17  ;;  %4209 = vst [vmem:[#allocation7_spill] sm:$0xff] %v2686_v20  ;;  %v2701_v23 = vld [vmem:[%s4143_s2 + $0x48] sm:$0xff]  ;;  %v2706_v24 = vld [vmem:[%s4143_s2 + $0x40] sm:$0xff]  ;;  %s2551_s12 = smov 1  }
  0x13   : > { %v2421_v3 = vld [vmem:[%s2614_s23] sm:$0xff]   ;;  %v2422_v4 = vld [vmem:[%s2614_s23 + $0x8] sm:$0xff]   ;;  %v2423_v5 = vld [vmem:[%s2614_s23 + $0x10] sm:$0xff]   ;;  %4210 = vst [vmem:[#allocation8_spill] sm:$0xff] %v2701_v23  ;;  %s2987_s21 = scalar_lea.vmem %s4144_s3, %s2367_s18  ;;  %s2554_s28 = smov 4  }
  0x14   : > { %542 = vmatpush1.bf16.msra.mxu0 %v2421_v3  ;;  %2351 = vmatpush1.bf16.msra.mxu1 %v2421_v3  ;;  %v2424_v6 = vld [vmem:[%s2614_s23 + $0x18] sm:$0xff]   ;;  %v2425_v7 = vld [vmem:[%s2614_s23 + $0x20] sm:$0xff]   ;;  %v2426_v8 = vld [vmem:[%s2614_s23 + $0x28] sm:$0xff]   ;;  %s2557_s10 = smov 16   ;;  %s2558_s26 = smov 32  }
  0x15   : > { %543 = vmatprep.subr.bf16.mxu0 %v4147_v0  ;;  %2336 = vmatprep.subr.bf16.mxu1 %v4147_v0  ;;  %v2427_v9 = vld [vmem:[%s2614_s23 + $0x30] sm:$0xff]   ;;  %v2428_v10 = vld [vmem:[%s2614_s23 + $0x38] sm:$0xff]   ;;  %v2429_v11 = vld [vmem:[%s2614_s23 + $0x40] sm:$0xff]   ;;  %s2559_s27 = smov 64  }
  0x16   : > { %v2430_v16 = vld [vmem:[%s2614_s23 + $0x48] sm:$0xff]   ;;  %793 = vperm.xlu1 %2405, %v2656_v14   ;;  %783 = vperm.xlu0 %2404, %v2661_v15   ;;  %v2431_v19 = vld [vmem:[%s2614_s23 + $0x50] sm:$0xff]   ;;  %v2432_v22 = vld [vmem:[%s2614_s23 + $0x58] sm:$0xff]  }
  0x17   : > { %v2433_v25 = vld [vmem:[%s2614_s23 + $0x60] sm:$0xff]   ;;  %v2716_v26 = vld [vmem:[%s4143_s2 + $0x58] sm:$0xff]  ;;  %v2721_v27 = vld [vmem:[%s4143_s2 + $0x50] sm:$0xff] }
  0x18   : > { %544 = vmatpush1.bf16.msra.mxu0 %v2422_v4  ;;  %2352 = vmatpush1.bf16.msra.mxu1 %v2422_v4  ;;  %4211 = vst [vmem:[#allocation9_spill] sm:$0xff] %v2716_v26  ;;  %v2434_v28 = vld [vmem:[%s2614_s23 + $0x68] sm:$0xff]   ;;  %v2736_v30 = vld [vmem:[%s4143_s2 + $0x60] sm:$0xff]  ;;  %v2435_v31 = vld [vmem:[%s2614_s23 + $0x70] sm:$0xff]  }
  0x19   : > { %545 = vmatprep.subr.bf16.mxu0 %v4147_v0  ;;  %2337 = vmatprep.subr.bf16.mxu1 %v4147_v0  ;;  %v2731_v29 = vld [vmem:[%s4143_s2 + $0x68] sm:$0xff]  ;;  %v2746_v32 = vld [vmem:[%s4143_s2 + $0x78] sm:$0xff]  ;;  %v2751_v33 = vld [vmem:[%s4143_s2 + $0x70] sm:$0xff] }
  0x1a   : > { %803 = vperm.xlu1 %2405, %v2671_v17   ;;  %798 = vperm.xlu0 %2404, %v2676_v18   ;;  %4212 = vst [vmem:[#allocation10_spill] sm:$0xff] %v2731_v29  ;;  %4213 = vst [vmem:[#allocation11_spill] sm:$0xff] %v2746_v32  ;;  %v2436_v34 = vld [vmem:[%s2614_s23 + $0x78] sm:$0xff]   ;;  %v2437_v35 = vld [vmem:[%s4142_s1] ss:$8 sps:$4 sm:$0xff]  }
  0x1b   : > { %v2440_v36 = vld [vmem:[%s4142_s1 + $0x90] ss:$8 sps:$4 sm:$0xff]   ;;  %v2767_v37 = vld [vmem:[%s4143_s2 + $0x88] sm:$0xff]  ;;  %v2772_v38 = vld [vmem:[%s4143_s2 + $0x80] sm:$0xff] }
  0x1c   : > { %546 = vmatpush1.bf16.msra.mxu0 %v2423_v5  ;;  %2353 = vmatpush1.bf16.msra.mxu1 %v2423_v5  ;;  %4214 = vst [vmem:[#allocation12_spill] sm:$0xff] %v2772_v38  ;;  %v2443_v39 = vld [vmem:[%s4142_s1 + $0x14] ss:$8 sps:$4 sm:$0xff]   ;;  %v2445_v40 = vld [vmem:[%s4142_s1 + $0xa4] ss:$8 sps:$4 sm:$0xff]  }
  0x1d   : > { %547 = vmatprep.subr.bf16.mxu0 %v4147_v0  ;;  %2338 = vmatprep.subr.bf16.mxu1 %v4147_v0  ;;  %v2785_v41 = vld [vmem:[%s4143_s2 + $0x98] sm:$0xff]  ;;  %v950_v42 = vld [vmem:[%s4143_s2 + $0x90] sm:$0xff]  ;;  %v2448_v44 = vld [vmem:[%s4142_s1 + $0xa0] ss:$8 sps:$4 sm:$0xff]  }
  0x1e   : > { %813 = vperm.xlu1 %2405, %v2686_v20   ;;  %808 = vperm.xlu0 %2404, %v2691_v21   ;;  %4215 = vst [vmem:[#allocation13_spill] sm:$0xff] %v2785_v41  ;;  %v2447_v43 = vld [vmem:[%s4142_s1 + $0x10] ss:$8 sps:$4 sm:$0xff]   ;;  %v2800_v45 = vld [vmem:[%s4143_s2 + $0xa8] sm:$0xff]  ;;  %v2805_v46 = vld [vmem:[%s4143_s2 + $0xa0] sm:$0xff] }
  0x1f   : > { %4216 = vst [vmem:[#allocation14_spill] sm:$0xff] %v2800_v45  ;;  %v2449_v47 = vld [vmem:[%s4142_s1 + $0x24] ss:$8 sps:$4 sm:$0xff]   ;;  %v2451_v48 = vld [vmem:[%s4142_s1 + $0xb4] ss:$8 sps:$4 sm:$0xff]  }
  0x20   : > { %548 = vmatpush1.bf16.msra.mxu0 %v2424_v6  ;;  %2354 = vmatpush1.bf16.msra.mxu1 %v2424_v6  ;;  %v2818_v49 = vld [vmem:[%s4143_s2 + $0xb8] sm:$0xff]  ;;  %v2823_v50 = vld [vmem:[%s4143_s2 + $0xb0] sm:$0xff]  ;;  %v2453_v51 = vld [vmem:[%s4142_s1 + $0x20] ss:$8 sps:$4 sm:$0xff]  }
  0x21   : > { %549 = vmatprep.subr.bf16.mxu0 %v4147_v0  ;;  %2339 = vmatprep.subr.bf16.mxu1 %v4147_v0  ;;  %4217 = vst [vmem:[#allocation15_spill] sm:$0xff] %v2818_v49  ;;  %v2454_v52 = vld [vmem:[%s4142_s1 + $0xb0] ss:$8 sps:$4 sm:$0xff]   ;;  %v2836_v53 = vld [vmem:[%s4143_s2 + $0xc8] sm:$0xff]  ;;  %v2841_v54 = vld [vmem:[%s4143_s2 + $0xc0] sm:$0xff] }
  0x22   : > { %823 = vperm.xlu1 %2405, %v2701_v23   ;;  %818 = vperm.xlu0 %2404, %v2706_v24   ;;  %4218 = vst [vmem:[#allocation16_spill] sm:$0xff] %v2836_v53  ;;  %v2455_v55 = vld [vmem:[%s4142_s1 + $0x34] ss:$8 sps:$4 sm:$0xff]   ;;  %v2457_v56 = vld [vmem:[%s4142_s1 + $0xc4] ss:$8 sps:$4 sm:$0xff]  }
  0x23   : > { %v2854_v57 = vld [vmem:[%s4143_s2 + $0xd8] sm:$0xff]  ;;  %v2859_v58 = vld [vmem:[%s4143_s2 + $0xd0] sm:$0xff]  ;;  %v2460_v60 = vld [vmem:[%s4142_s1 + $0xc0] ss:$8 sps:$4 sm:$0xff]  }
  0x24   : > { %550 = vmatpush1.bf16.msra.mxu0 %v2425_v7  ;;  %2355 = vmatpush1.bf16.msra.mxu1 %v2425_v7  ;;  %4219 = vst [vmem:[#allocation17_spill] sm:$0xff] %v2854_v57  ;;  %4220 = vst [vmem:[#allocation18_spill] sm:$0xff] %v2859_v58  ;;  %v2459_v59 = vld [vmem:[%s4142_s1 + $0x30] ss:$8 sps:$4 sm:$0xff]   ;;  %v2872_v61 = vld [vmem:[%s4143_s2 + $0xe8] sm:$0xff] }
  0x25   : > { %551 = vmatprep.subr.bf16.mxu0 %v4147_v0  ;;  %2340 = vmatprep.subr.bf16.mxu1 %v4147_v0  ;;  %4221 = vst [vmem:[#allocation19_spill] sm:$0xff] %v2872_v61  ;;  %v2877_v62 = vld [vmem:[%s4143_s2 + $0xe0] sm:$0xff]  ;;  %v2463_v1 = vld [vmem:[%s4142_s1 + $0xd4] ss:$8 sps:$4 sm:$0xff]   ;;  %v2466_v5 = vld [vmem:[%s4142_s1 + $0xd0] ss:$8 sps:$4 sm:$0xff]  }
  0x26   : > { %833 = vperm.xlu1 %2405, %v2716_v26   ;;  %828 = vperm.xlu0 %2404, %v2721_v27   ;;  %4222 = vst [vmem:[#allocation20_spill] sm:$0xff] %v2877_v62  ;;  %v2461_v63 = vld [vmem:[%s4142_s1 + $0x44] ss:$8 sps:$4 sm:$0xff]   ;;  %v2890_v2 = vld [vmem:[%s4143_s2 + $0xf8] sm:$0xff]  ;;  %v2895_v3 = vld [vmem:[%s4143_s2 + $0xf0] sm:$0xff] }
  0x27   : > { %4223 = vst [vmem:[#allocation21_spill] sm:$0xff] %v2890_v2  ;;  %4224 = vst [vmem:[#allocation22_spill] sm:$0xff] %v2895_v3  ;;  %v2465_v4 = vld [vmem:[%s4142_s1 + $0x40] ss:$8 sps:$4 sm:$0xff]  }
  0x28   : > { %552 = vmatpush1.bf16.msra.mxu0 %v2426_v8  ;;  %2356 = vmatpush1.bf16.msra.mxu1 %v2426_v8  ;;  %v2908_v6 = vld [vmem:[%s4143_s2 + $0x108] sm:$0xff]  ;;  %v1122_v7 = vld [vmem:[%s4143_s2 + $0x100] sm:$0xff]  ;;  %v2467_v8 = vld [vmem:[%s4142_s1 + $0x54] ss:$8 sps:$4 sm:$0xff]  }
  0x29   : > { %553 = vmatprep.subr.bf16.mxu0 %v4147_v0  ;;  %2341 = vmatprep.subr.bf16.mxu1 %v4147_v0  ;;  %4225 = vst [vmem:[#allocation23_spill] sm:$0xff] %v2908_v6 }
  0x2a   : > { %843 = vperm.xlu1 %2405, %v2731_v29   ;;  %838 = vperm.xlu0 %2404, %v2736_v30  }
  0x2c   : > { %554 = vmatpush1.bf16.msra.mxu0 %v2427_v9  ;;  %2357 = vmatpush1.bf16.msra.mxu1 %v2427_v9  ;;  %v2469_v9 = vld [vmem:[%s4142_s1 + $0xe4] ss:$8 sps:$4 sm:$0xff]  }
  0x2d   : > { %555 = vmatprep.subr.bf16.mxu0 %v4147_v0  ;;  %2342 = vmatprep.subr.bf16.mxu1 %v4147_v0 }
  0x2e   : > { %853 = vperm.xlu1 %2405, %v2746_v32   ;;  %848 = vperm.xlu0 %2404, %v2751_v33  }
  0x30   : > { %556 = vmatpush1.bf16.msra.mxu0 %v2428_v10  ;;  %2358 = vmatpush1.bf16.msra.mxu1 %v2428_v10  ;;  %v2471_v10 = vld [vmem:[%s4142_s1 + $0x50] ss:$8 sps:$4 sm:$0xff]  }
  0x31   : > { %557 = vmatprep.subr.bf16.mxu0 %v4147_v0  ;;  %2343 = vmatprep.subr.bf16.mxu1 %v4147_v0 }
  0x32   : > { %971 = vperm.xlu1 %2405, %v2767_v37   ;;  %966 = vperm.xlu0 %2404, %v2772_v38  }
  0x34   : > { %558 = vmatpush1.bf16.msra.mxu0 %v2429_v11  ;;  %2359 = vmatpush1.bf16.msra.mxu1 %v2429_v11  ;;  %v2472_v11 = vld [vmem:[%s4142_s1 + $0xe0] ss:$8 sps:$4 sm:$0xff]  }
  0x35   : > { %559 = vmatprep.subr.bf16.mxu0 %v4147_v0  ;;  %2344 = vmatprep.subr.bf16.mxu1 %v4147_v0 }
  0x36   : > { %981 = vperm.xlu1 %2405, %v2785_v41   ;;  %976 = vperm.xlu0 %2404, %v950_v42  }
  0x38   : > { %560 = vmatpush1.bf16.msra.mxu0 %v2430_v16  ;;  %2360 = vmatpush1.bf16.msra.mxu1 %v2430_v16  ;;  %v2473_v16 = vld [vmem:[%s4142_s1 + $0x64] ss:$8 sps:$4 sm:$0xff]  }
  0x39   : > { %561 = vmatprep.subr.bf16.mxu0 %v4147_v0  ;;  %2345 = vmatprep.subr.bf16.mxu1 %v4147_v0 }
  0x3a   : > { %991 = vperm.xlu1 %2405, %v2800_v45   ;;  %986 = vperm.xlu0 %2404, %v2805_v46  }
  0x3c   : > { %562 = vmatpush1.bf16.msra.mxu0 %v2431_v19  ;;  %2361 = vmatpush1.bf16.msra.mxu1 %v2431_v19  ;;  %v2475_v19 = vld [vmem:[%s4142_s1 + $0xf4] ss:$8 sps:$4 sm:$0xff]  }
  0x3d   : > { %563 = vmatprep.subr.bf16.mxu0 %v4147_v0  ;;  %2346 = vmatprep.subr.bf16.mxu1 %v4147_v0 }
  0x3e   : > { %1001 = vperm.xlu1 %2405, %v2818_v49   ;;  %996 = vperm.xlu0 %2404, %v2823_v50  }
  0x40   : > { %564 = vmatpush1.bf16.msra.mxu0 %v2432_v22  ;;  %2362 = vmatpush1.bf16.msra.mxu1 %v2432_v22  ;;  %v2477_v22 = vld [vmem:[%s4142_s1 + $0x60] ss:$8 sps:$4 sm:$0xff]  }
  0x41   : > { %565 = vmatprep.subr.bf16.mxu0 %v4147_v0  ;;  %2347 = vmatprep.subr.bf16.mxu1 %v4147_v0 }
  0x42   : > { %1011 = vperm.xlu1 %2405, %v2836_v53   ;;  %1006 = vperm.xlu0 %2404, %v2841_v54  }
  0x44   : > { %566 = vmatpush1.bf16.msra.mxu0 %v2433_v25  ;;  %2363 = vmatpush1.bf16.msra.mxu1 %v2433_v25  ;;  %v2478_v25 = vld [vmem:[%s4142_s1 + $0xf0] ss:$8 sps:$4 sm:$0xff]  }
  0x45   : > { %567 = vmatprep.subr.bf16.mxu0 %v4147_v0  ;;  %2348 = vmatprep.subr.bf16.mxu1 %v4147_v0 }
  0x46   : > { %1021 = vperm.xlu1 %2405, %v2854_v57   ;;  %1016 = vperm.xlu0 %2404, %v2859_v58  }
  0x48   : > { %568 = vmatpush1.bf16.msra.mxu0 %v2434_v28  ;;  %2364 = vmatpush1.bf16.msra.mxu1 %v2434_v28  ;;  %v2479_v28 = vld [vmem:[%s4142_s1 + $0x74] ss:$8 sps:$4 sm:$0xff]  }
  0x49   : > { %569 = vmatprep.subr.bf16.mxu0 %v4147_v0  ;;  %2349 = vmatprep.subr.bf16.mxu1 %v4147_v0 }
  0x4a   : > { %1031 = vperm.xlu1 %2405, %v2872_v61   ;;  %1026 = vperm.xlu0 %2404, %v2877_v62  }
  0x4c   : > { %570 = vmatpush1.bf16.msra.mxu0 %v2435_v31  ;;  %2365 = vmatpush1.bf16.msra.mxu1 %v2435_v31  ;;  %v2481_v31 = vld [vmem:[%s4142_s1 + $0x104] ss:$8 sps:$4 sm:$0xff]  }
  0x4d   : > { %571 = vmatprep.subr.bf16.mxu0 %v4147_v0  ;;  %2350 = vmatprep.subr.bf16.mxu1 %v4147_v0 }
  0x4e   : > { %1041 = vperm.xlu1 %2405, %v2890_v2   ;;  %1036 = vperm.xlu0 %2404, %v2895_v3  }
  0x50   : > { %572 = vmatpush1.bf16.msra.mxu0 %v2436_v34  ;;  %2366 = vmatpush1.bf16.msra.mxu1 %v2436_v34  ;;  %v2483_v34 = vld [vmem:[%s4142_s1 + $0x70] ss:$8 sps:$4 sm:$0xff]  }
  0x52   : > { %1131 = vperm.xlu1 %2405, %v2908_v6   ;;  %1126 = vperm.xlu0 %2404, %v1122_v7   ;;  %v4145_v7 = vmov 1  }
  0x53   : > { %574 = vmatmul.mubr.bf16.vlgmr.msra.gmra.mrb[0].mxu0 %v2437_v35  ;;  %646 = vmatmul.mubr.bf16.vlgmr.msra.gmra.mrb[0].mxu1 %v2440_v36  ;;  %v2484_v35 = vld [vmem:[%s4142_s1 + $0x100] ss:$8 sps:$4 sm:$0xff]   ;;  %v2485_v36 = vld [vmem:[%s4142_s1 + $0x84] ss:$8 sps:$4 sm:$0xff]  }
  0x54   : > { %581 = vmatprep.mubr.bf16.mxu0 %v2443_v39  ;;  %653 = vmatprep.mubr.bf16.mxu1 %v2445_v40  ;;  %v2487_v39 = vld [vmem:[%s4142_s1 + $0x80] ss:$8 sps:$4 sm:$0xff]  }
  0x56   : > { %2407 = vset.pattern.permute.xlu0 %v4145_v7 }
  0x5b   : > { %582 = vmatmul.mubr.bf16.gmra.mrb[4].mxu0 %v2447_v43  ;;  %654 = vmatmul.mubr.bf16.gmra.mrb[4].mxu1 %v2448_v44 }
  0x5c   : > { %589 = vmatprep.mubr.bf16.mxu0 %v2449_v47  ;;  %661 = vmatprep.mubr.bf16.mxu1 %v2451_v48 }
  0x63   : > { %590 = vmatmul.mubr.bf16.gmra.mrb[8].mxu0 %v2453_v51  ;;  %662 = vmatmul.mubr.bf16.gmra.mrb[8].mxu1 %v2454_v52 }
  0x64   : > { %597 = vmatprep.mubr.bf16.mxu0 %v2455_v55  ;;  %669 = vmatprep.mubr.bf16.mxu1 %v2457_v56 }
  0x6b   : > { %598 = vmatmul.mubr.bf16.gmra.mrb[12].mxu0 %v2459_v59  ;;  %670 = vmatmul.mubr.bf16.gmra.mrb[12].mxu1 %v2460_v60 }
  0x6c   : > { %605 = vmatprep.mubr.bf16.mxu0 %v2461_v63  ;;  %677 = vmatprep.mubr.bf16.mxu1 %v2463_v1 }
  0x73   : > { %606 = vmatmul.mubr.bf16.gmra.mrb[16].mxu0 %v2465_v4  ;;  %678 = vmatmul.mubr.bf16.gmra.mrb[16].mxu1 %v2466_v5 }
  0x74   : > { %613 = vmatprep.mubr.bf16.mxu0 %v2467_v8  ;;  %685 = vmatprep.mubr.bf16.mxu1 %v2469_v9 }
  0x7b   : > { %614 = vmatmul.mubr.bf16.gmra.mrb[20].mxu0 %v2471_v10  ;;  %686 = vmatmul.mubr.bf16.gmra.mrb[20].mxu1 %v2472_v11 }
  0x7c   : > { %621 = vmatprep.mubr.bf16.mxu0 %v2473_v16  ;;  %693 = vmatprep.mubr.bf16.mxu1 %v2475_v19 }
  0x83   : > { %622 = vmatmul.mubr.bf16.gmra.mrb[24].mxu0 %v2477_v22  ;;  %694 = vmatmul.mubr.bf16.gmra.mrb[24].mxu1 %v2478_v25 }
  0x84   : > { %629 = vmatprep.mubr.bf16.mxu0 %v2479_v28  ;;  %701 = vmatprep.mubr.bf16.mxu1 %v2481_v31 }
  0x8b   : > { %630 = vmatmul.mubr.bf16.gmra.mrb[28].mxu0 %v2483_v34  ;;  %702 = vmatmul.mubr.bf16.gmra.mrb[28].mxu1 %v2484_v35 }
  0x8c   : > { %637 = vmatprep.mubr.bf16.mxu0 %v2485_v36 }
  0x91   : > { %v789_v40 = vpop.permute.xlu1 %788  ;;  %v779_v42 = vpop.permute.xlu0 %778 }
  0x93   : > { %638 = vmatmul.mubr.bf16.gmra.mrb[32].mxu0 %v2487_v39 }
  0x95   : > { %v794_v43 = vpop.permute.xlu1 %793  ;;  %v784_v44 = vpop.permute.xlu0 %783 }
  0x99   : > { %v2956_v47 = vpop.permute.xlu1 %803  ;;  %v799_v48 = vpop.permute.xlu0 %798 }
  0x9d   : > { %v2958_v51 = vpop.permute.xlu1 %813  ;;  %v2960_v52 = vpop.permute.xlu0 %808 }
  0xa1   : > { %v2962_v55 = vpop.permute.xlu1 %823  ;;  %v2964_v56 = vpop.permute.xlu0 %818 }
  0xa5   : > { %v2966_v59 = vpop.permute.xlu1 %833  ;;  %v2968_v60 = vpop.permute.xlu0 %828 }
  0xa9   : > { %v2970_v63 = vpop.permute.xlu1 %843  ;;  %v2972_v1 = vpop.permute.xlu0 %838 }
  0xad   : > { %v2974_v4 = vpop.permute.xlu1 %853  ;;  %v2976_v5 = vpop.permute.xlu0 %848 }
  0xb1   : > { %v2979_v8 = vpop.permute.xlu1 %971  ;;  %v2981_v9 = vpop.permute.xlu0 %966 }
  0xb5   : > { %v2989_v10 = vpop.permute.xlu1 %981  ;;  %v2991_v11 = vpop.permute.xlu0 %976 }
  0xb9   : > { %v3005_v14 = vpop.permute.xlu1 %991 }
 0x126   : > { %v2993_v16 = vpop.f32.mrb[0].mxu0  ;;  %v2995_v19 = vpop.f32.mrb[0].mxu1 }
 0x127   : > { %4226 = vst [vmem:[#allocation24_spill] sm:$0xff] %v2993_v16  ;;  %v856_v22 = vadd.f32 %v779_v42, %v2993_v16  ;;  %v577_v25 = vpop.f32.mrb[1].mxu0  ;;  %728 = vst [vmem:[%s2987_s21 + $0x90] sm:$0xff] %v2995_v19  ;;  %v649_v28 = vpop.f32.mrb[1].mxu1 }
 0x128   : > { %v3000_v31 = vpop.f32.mrb[2].mxu0  ;;  %v3002_v34 = vpop.f32.mrb[2].mxu1 }
 0x129   : > { %4227 = vst [vmem:[#allocation25_spill] sm:$0xff] %v3000_v31  ;;  %v857_v35 = vadd.f32 %v784_v44, %v3000_v31  ;;  %v580_v36 = vpop.f32.mrb[3].mxu0  ;;  %v652_v39 = vpop.f32.mrb[3].mxu1  ;;  %v894_v7 = vmul.f32 %v856_v22, %v856_v22 }
 0x12a   : > { %v3007_v42 = vpop.permute.xlu0 %986 }
 0x12b   : > { %v872_v0 = vadd.f32 %v857_v35, %v856_v22  ;;  %v895_v17 = vmul.f32 %v857_v35, %v857_v35 }
 0x12d   : > { %v910_v6 = vadd.f32 %v895_v17, %v894_v7 }
 0x12e   : > { %v3009_v25 = vpop.f32.mrb[4].mxu0  ;;  %v3011_v28 = vpop.f32.mrb[4].mxu1 }
 0x12f   : > { %4228 = vst [vmem:[#allocation26_spill] sm:$0xff] %v3009_v25  ;;  %v858_v16 = vadd.f32 %v789_v40, %v3009_v25  ;;  %v585_v2 = vpop.f32.mrb[5].mxu0  ;;  %730 = vst [vmem:[%s2987_s21 + $0xa0] sm:$0xff] %v3011_v28  ;;  %v657_v44 = vpop.f32.mrb[5].mxu1 }
 0x130   : > { %v3016_v36 = vpop.f32.mrb[6].mxu0  ;;  %v3018_v39 = vpop.f32.mrb[6].mxu1 }
 0x131   : > { %4229 = vst [vmem:[#allocation27_spill] sm:$0xff] %v3016_v36  ;;  %v873_v17 = vadd.f32 %v872_v0, %v858_v16  ;;  %v896_v7 = vmul.f32 %v858_v16, %v858_v16  ;;  %v859_v22 = vadd.f32 %v794_v43, %v3016_v36  ;;  %v588_v35 = vpop.f32.mrb[7].mxu0  ;;  %v660_v31 = vpop.f32.mrb[7].mxu1 }
 0x132   : > { %v3021_v40 = vpop.permute.xlu1 %1001  ;;  %v3023_v2 = vpop.permute.xlu0 %996 }
 0x133   : > { %v911_v12 = vadd.f32 %v910_v6, %v896_v7  ;;  %v874_v61 = vadd.f32 %v873_v17, %v859_v22  ;;  %v897_v57 = vmul.f32 %v859_v22, %v859_v22 }
 0x135   : > { %v912_v53 = vadd.f32 %v911_v12, %v897_v57 }
 0x136   : > { %v3025_v44 = vpop.f32.mrb[8].mxu0  ;;  %v3027_v25 = vpop.f32.mrb[8].mxu1 }
 0x137   : > { %4230 = vst [vmem:[#allocation28_spill] sm:$0xff] %v3025_v44  ;;  %v860_v49 = vadd.f32 %v799_v48, %v3025_v44  ;;  %v593_v0 = vpop.f32.mrb[9].mxu0  ;;  %732 = vst [vmem:[%s2987_s21 + $0xb0] sm:$0xff] %v3027_v25  ;;  %v665_v43 = vpop.f32.mrb[9].mxu1 }
 0x138   : > { %v3032_v16 = vpop.f32.mrb[10].mxu0  ;;  %v3034_v6 = vpop.f32.mrb[10].mxu1 }
 0x139   : > { %4231 = vst [vmem:[#allocation29_spill] sm:$0xff] %v3032_v16  ;;  %v875_v12 = vadd.f32 %v874_v61, %v860_v49  ;;  %v898_v57 = vmul.f32 %v860_v49, %v860_v49  ;;  %v861_v31 = vadd.f32 %v2956_v47, %v3032_v16  ;;  %v596_v17 = vpop.f32.mrb[11].mxu0  ;;  %v668_v7 = vpop.f32.mrb[11].mxu1 }
 0x13a   : > { %v3038_v48 = vpop.permute.xlu1 %1011  ;;  %v3040_v0 = vpop.permute.xlu0 %1006 }
 0x13b   : > { %v913_v22 = vadd.f32 %v912_v53, %v898_v57  ;;  %v876_v35 = vadd.f32 %v875_v12, %v861_v31  ;;  %v899_v36 = vmul.f32 %v861_v31, %v861_v31 }
 0x13d   : > { %v914_v43 = vadd.f32 %v913_v22, %v899_v36 }
 0x13e   : > { %v3042_v44 = vpop.f32.mrb[12].mxu0  ;;  %v3044_v45 = vpop.f32.mrb[12].mxu1 }
 0x13f   : > { %4232 = vst [vmem:[#allocation30_spill] sm:$0xff] %v3042_v44  ;;  %v862_v49 = vadd.f32 %v2960_v52, %v3042_v44  ;;  %v601_v61 = vpop.f32.mrb[13].mxu0  ;;  %734 = vst [vmem:[%s2987_s21 + $0xc0] sm:$0xff] %v3044_v45  ;;  %v673_v47 = vpop.f32.mrb[13].mxu1 }
 0x140   : > { %v3050_v53 = vpop.f32.mrb[14].mxu0  ;;  %v3052_v12 = vpop.f32.mrb[14].mxu1 }
 0x141   : > { %4233 = vst [vmem:[#allocation31_spill] sm:$0xff] %v3050_v53  ;;  %v900_v57 = vmul.f32 %v862_v49, %v862_v49  ;;  %v863_v36 = vadd.f32 %v2958_v51, %v3050_v53  ;;  %v604_v31 = vpop.f32.mrb[15].mxu0  ;;  %v676_v17 = vpop.f32.mrb[15].mxu1  ;;  %v877_v7 = vadd.f32 %v876_v35, %v862_v49 }
 0x142   : > { %v3056_v52 = vpop.permute.xlu1 %1021  ;;  %v3058_v61 = vpop.permute.xlu0 %1016 }
 0x143   : > { %v878_v22 = vadd.f32 %v877_v7, %v863_v36  ;;  %v901_v16 = vmul.f32 %v863_v36, %v863_v36  ;;  %v915_v41 = vadd.f32 %v914_v43, %v900_v57 }
 0x145   : > { %v916_v47 = vadd.f32 %v915_v41, %v901_v16 }
 0x146   : > { %v3060_v44 = vpop.f32.mrb[16].mxu0  ;;  %v3062_v38 = vpop.f32.mrb[16].mxu1 }
 0x147   : > { %4234 = vst [vmem:[#allocation32_spill] sm:$0xff] %v3060_v44  ;;  %736 = vst [vmem:[%s2987_s21 + $0xd0] sm:$0xff] %v3062_v38  ;;  %v609_v32 = vpop.f32.mrb[17].mxu0  ;;  %v681_v29 = vpop.f32.mrb[17].mxu1  ;;  %v864_v51 = vadd.f32 %v2964_v56, %v3060_v44 }
 0x148   : > { %v3068_v35 = vpop.f32.mrb[18].mxu0  ;;  %v3070_v43 = vpop.f32.mrb[18].mxu1 }
 0x149   : > { %4235 = vst [vmem:[#allocation33_spill] sm:$0xff] %v3068_v35  ;;  %v612_v49 = vpop.f32.mrb[19].mxu0  ;;  %v684_v57 = vpop.f32.mrb[19].mxu1  ;;  %v865_v41 = vadd.f32 %v2962_v55, %v3068_v35  ;;  %v879_v16 = vadd.f32 %v878_v22, %v864_v51  ;;  %v902_v36 = vmul.f32 %v864_v51, %v864_v51 }
 0x14a   : > { %v3074_v32 = vpop.permute.xlu1 %1031  ;;  %v3076_v29 = vpop.permute.xlu0 %1026 }
 0x14b   : > { %v880_v31 = vadd.f32 %v879_v16, %v865_v41  ;;  %v903_v17 = vmul.f32 %v865_v41, %v865_v41  ;;  %v917_v7 = vadd.f32 %v916_v47, %v902_v36 }
 0x14d   : > { %v918_v56 = vadd.f32 %v917_v7, %v903_v17 }
 0x14e   : > { %v3078_v44 = vpop.f32.mrb[20].mxu0  ;;  %v3080_v53 = vpop.f32.mrb[20].mxu1 }
 0x14f   : > { %4236 = vst [vmem:[#allocation34_spill] sm:$0xff] %v3078_v44  ;;  %738 = vst [vmem:[%s2987_s21 + $0xe0] sm:$0xff] %v3080_v53  ;;  %v617_v49 = vpop.f32.mrb[21].mxu0  ;;  %v689_v57 = vpop.f32.mrb[21].mxu1  ;;  %v866_v55 = vadd.f32 %v2968_v60, %v3078_v44 }
 0x150   : > { %v3086_v22 = vpop.f32.mrb[22].mxu0  ;;  %v3088_v47 = vpop.f32.mrb[22].mxu1 }
 0x151   : > { %4237 = vst [vmem:[#allocation35_spill] sm:$0xff] %v3086_v22  ;;  %v620_v51 = vpop.f32.mrb[23].mxu0  ;;  %v692_v41 = vpop.f32.mrb[23].mxu1  ;;  %v867_v16 = vadd.f32 %v2966_v59, %v3086_v22  ;;  %v881_v36 = vadd.f32 %v880_v31, %v866_v55  ;;  %v904_v17 = vmul.f32 %v866_v55, %v866_v55 }
 0x152   : > { %v3092_v49 = vpop.permute.xlu1 %1041  ;;  %v3094_v57 = vpop.permute.xlu0 %1036 }
 0x153   : > { %v882_v7 = vadd.f32 %v881_v36, %v867_v16  ;;  %v905_v35 = vmul.f32 %v867_v16, %v867_v16  ;;  %v919_v26 = vadd.f32 %v918_v56, %v904_v17 }
 0x155   : > { %v920_v60 = vadd.f32 %v919_v26, %v905_v35 }
 0x156   : > { %v3096_v44 = vpop.f32.mrb[24].mxu0  ;;  %v3098_v23 = vpop.f32.mrb[24].mxu1 }
 0x157   : > { %4238 = vst [vmem:[#allocation36_spill] sm:$0xff] %v3096_v44  ;;  %740 = vst [vmem:[%s2987_s21 + $0xf0] sm:$0xff] %v3098_v23  ;;  %v625_v51 = vpop.f32.mrb[25].mxu0  ;;  %v697_v41 = vpop.f32.mrb[25].mxu1  ;;  %v868_v59 = vadd.f32 %v2972_v1, %v3096_v44 }
 0x158   : > { %v3104_v31 = vpop.f32.mrb[26].mxu0  ;;  %v3106_v56 = vpop.f32.mrb[26].mxu1 }
 0x159   : > { %4239 = vst [vmem:[#allocation37_spill] sm:$0xff] %v3104_v31  ;;  %v628_v55 = vpop.f32.mrb[27].mxu0  ;;  %v700_v16 = vpop.f32.mrb[27].mxu1  ;;  %v869_v26 = vadd.f32 %v2970_v63, %v3104_v31  ;;  %v883_v35 = vadd.f32 %v882_v7, %v868_v59  ;;  %v906_v36 = vmul.f32 %v868_v59, %v868_v59 }
 0x15a   : > { %v1132_v51 = vpop.permute.xlu1 %1131  ;;  %v1127_v41 = vpop.permute.xlu0 %1126 }
 0x15b   : > { %v884_v17 = vadd.f32 %v883_v35, %v869_v26  ;;  %v907_v22 = vmul.f32 %v869_v26, %v869_v26  ;;  %v921_v20 = vadd.f32 %v920_v60, %v906_v36 }
 0x15d   : > { %v922_v13 = vadd.f32 %v921_v20, %v907_v22 }
 0x15e   : > { %v3110_v3 = vpop.f32.mrb[28].mxu0  ;;  %v703_v1 = vpop.f32.mrb[28].mxu1 }
 0x15f   : > { %4240 = vst [vmem:[#allocation38_spill] sm:$0xff] %v3110_v3  ;;  %742 = vst [vmem:[%s2987_s21 + $0x100] sm:$0xff] %v703_v1  ;;  %v633_v44 = vpop.f32.mrb[29].mxu0  ;;  %v705_v62 = vpop.f32.mrb[29].mxu1  ;;  %v870_v55 = vadd.f32 %v2976_v5, %v3110_v3  ;;  %v1134_v7 = vadd.f32 %v1127_v41, %v703_v1 }
 0x160   : > { %v3115_v16 = vpop.f32.mrb[30].mxu0  ;;  %v3117_v63 = vpop.f32.mrb[30].mxu1 }
 0x161   : > { %v636_v59 = vpop.f32.mrb[31].mxu0  ;;  %v708_v26 = vpop.f32.mrb[31].mxu1  ;;  %v871_v60 = vadd.f32 %v2974_v4, %v3115_v16  ;;  %v885_v20 = vadd.f32 %v884_v17, %v870_v55  ;;  %v908_v22 = vmul.f32 %v870_v55, %v870_v55  ;;  %v1135_v35 = vadd.f32 %v1132_v51, %v3117_v63 }
 0x162   : > { %v1144_v5 = vmul.f32 %v1134_v7, %v1134_v7  ;;  %v1046_v51 = vadd.f32 %v2991_v11, %v2995_v19  ;;  %v1047_v59 = vadd.f32 %v2989_v10, %v3002_v34  ;;  %v1049_v11 = vadd.f32 %v3005_v14, %v3018_v39 }
 0x163   : > { %v3122_v36 = vadd.f32 %v885_v20, %v871_v60  ;;  %v909_v62 = vmul.f32 %v871_v60, %v871_v60  ;;  %v923_v44 = vadd.f32 %v922_v13, %v908_v22  ;;  %v3124_v31 = vadd.f32 %v1135_v35, %v1134_v7 }
 0x164   : > { %v1145_v3 = vmul.f32 %v1135_v35, %v1135_v35  ;;  %v1084_v20 = vmul.f32 %v1046_v51, %v1046_v51 }
 0x165   : > { %v3126_v58 = vadd.f32 %v923_v44, %v909_v62  ;;  %v1085_v62 = vmul.f32 %v1047_v59, %v1047_v59 }
 0x166   : > { %v3128_v41 = vpop.f32.mrb[32].mxu0  ;;  %v3130_v1 = vadd.f32 %v1145_v3, %v1144_v5  ;;  %v1050_v5 = vadd.f32 %v3023_v2, %v3027_v25  ;;  %v1054_v2 = vadd.f32 %v3058_v61, %v3062_v38  ;;  %v887_v38 = vrot.slane %v3122_v36, 4 }
 0x167   : > { %v1044_v4 = vadd.f32 %v2981_v9, %v3128_v41  ;;  %v641_v17 = vpop.f32.mrb[33].mxu0  ;;  %v1048_v9 = vadd.f32 %v3007_v42, %v3011_v28 }
 0x168   : > { %v3134_v55 = vpop.f32.mrb[34].mxu0  ;;  %v1088_v28 = vmul.f32 %v1050_v5, %v1050_v5 }
 0x169   : > { %v1045_v13 = vadd.f32 %v2979_v8, %v3134_v55  ;;  %v644_v7 = vpop.f32.mrb[35].mxu0  ;;  %v1082_v26 = vmul.f32 %v1044_v4, %v1044_v4  ;;  %v1086_v8 = vmul.f32 %v1048_v9, %v1048_v9 }
 0x16b   : > { %v1060_v60 = vadd.f32 %v1045_v13, %v1044_v4  ;;  %v1083_v3 = vmul.f32 %v1045_v13, %v1045_v13  ;;  %v1087_v4 = vmul.f32 %v1049_v11, %v1049_v11  ;;  %v1051_v13 = vadd.f32 %v3021_v40, %v3034_v6 }
 0x16d   : > { %v1061_v22 = vadd.f32 %v1060_v60, %v1046_v51  ;;  %v1098_v35 = vadd.f32 %v1083_v3, %v1082_v26  ;;  %v1052_v51 = vadd.f32 %v3040_v0, %v3044_v45  ;;  %v1089_v3 = vmul.f32 %v1051_v13, %v1051_v13 }
 0x16e   : > { %v1056_v0 = vadd.f32 %v3076_v29, %v3080_v53  ;;  %v1137_v53 = vrot.slane %v3124_v31, 4  ;;  %v1059_v29 = vadd.f32 %v3092_v49, %v3106_v56 }
 0x16f   : > { %v1062_v19 = vadd.f32 %v1061_v22, %v1047_v59  ;;  %v1099_v44 = vadd.f32 %v1098_v35, %v1084_v20  ;;  %v1053_v59 = vadd.f32 %v3038_v48, %v3052_v12  ;;  %v1055_v22 = vadd.f32 %v3056_v52, %v3070_v43 }
 0x170   : > { %v1092_v48 = vmul.f32 %v1054_v2, %v1054_v2  ;;  %v1058_v52 = vadd.f32 %v3094_v57, %v3098_v23 }
 0x171   : > { %v1063_v10 = vadd.f32 %v1062_v19, %v1048_v9  ;;  %v1100_v17 = vadd.f32 %v1099_v44, %v1085_v62  ;;  %v1090_v9 = vmul.f32 %v1052_v51, %v1052_v51  ;;  %v1091_v62 = vmul.f32 %v1053_v59, %v1053_v59 }
 0x172   : > { %v1057_v44 = vadd.f32 %v3074_v32, %v3088_v47  ;;  %v888_v32 = vadd.f32 %v887_v38, %v3122_v36 }
 0x173   : > { %v1064_v7 = vadd.f32 %v1063_v10, %v1049_v11  ;;  %v1101_v42 = vadd.f32 %v1100_v17, %v1086_v8  ;;  %v1093_v8 = vmul.f32 %v1055_v22, %v1055_v22  ;;  %v1094_v10 = vmul.f32 %v1056_v0, %v1056_v0 }
 0x174   : > { %v925_v17 = vrot.slane %v3126_v58, 4 }
 0x175   : > { %v1065_v26 = vadd.f32 %v1064_v7, %v1050_v5  ;;  %v1102_v14 = vadd.f32 %v1101_v42, %v1087_v4  ;;  %v1095_v7 = vmul.f32 %v1057_v44, %v1057_v44 }
 0x176   : > { %v926_v23 = vadd.f32 %v925_v17, %v3126_v58 }
 0x177   : > { %v1066_v60 = vadd.f32 %v1065_v26, %v1051_v13  ;;  %v1103_v25 = vadd.f32 %v1102_v14, %v1088_v28  ;;  %v1096_v26 = vmul.f32 %v1058_v52, %v1058_v52 }
 0x179   : > { %v1067_v20 = vadd.f32 %v1066_v60, %v1052_v51  ;;  %v1104_v40 = vadd.f32 %v1103_v25, %v1089_v3  ;;  %v1147_v51 = vrot.slane %v3130_v1, 4  ;;  %v1097_v60 = vmul.f32 %v1059_v29, %v1059_v29 }
 0x17a   : > { %v889_v3 = vrot.slane %v888_v32, 2 }
 0x17b   : > { %v1068_v35 = vadd.f32 %v1067_v20, %v1053_v59  ;;  %v1105_v45 = vadd.f32 %v1104_v40, %v1090_v9  ;;  %v1138_v59 = vadd.f32 %v1137_v53, %v3124_v31  ;;  %v1148_v49 = vadd.f32 %v1147_v51, %v3130_v1 }
 0x17c   : > { %v927_v20 = vrot.slane %v926_v23, 2 }
 0x17d   : > { %v1069_v11 = vadd.f32 %v1068_v35, %v1054_v2  ;;  %v1106_v19 = vadd.f32 %v1105_v45, %v1091_v62  ;;  %v1139_v40 = vrot.slane %v1138_v59, 2  ;;  %v1149_v45 = vrot.slane %v1148_v49, 2 }
 0x17f   : > { %v1070_v61 = vadd.f32 %v1069_v11, %v1055_v22  ;;  %v1107_v5 = vadd.f32 %v1106_v19, %v1092_v48  ;;  %v890_v22 = vadd.f32 %v889_v3, %v888_v32  ;;  %v1140_v48 = vadd.f32 %v1139_v40, %v1138_v59  ;;  %v4242_v59 = vld [vmem:[#allocation20_spill] sm:$0xff] }
 0x180   : > { %v1150_v38 = vadd.f32 %v1149_v45, %v1148_v49  ;;  %v4244_v3 = vmov 0   ;;  %v4199_v49 = vlaneseq }
 0x181   : > { %v1071_v4 = vadd.f32 %v1070_v61, %v1056_v0  ;;  %v1108_v13 = vadd.f32 %v1107_v5, %v1093_v8  ;;  %v928_v0 = vadd.f32 %v927_v20, %v926_v23  ;;  %v891_v31 = vrot.slane %v890_v22, 1  ;;  %v4252_v20 = vld [vmem:[#allocation13_spill] sm:$0xff] }
 0x182   : > { %v2550_v61 = vmov 0.0  }
 0x183   : > { %v1072_v42 = vadd.f32 %v1071_v4, %v1057_v44  ;;  %v1109_v28 = vadd.f32 %v1108_v13, %v1094_v10  ;;  %208 = vst.msk [vmem:[#allocation2] sm:$0x3] %vm207_vm0, %v2550_v61  ;;  %v929_v1 = vrot.slane %v928_v0, 1  ;;  %v892_v10 = vadd.f32 %v891_v31, %v890_v22  ;;  %v4259_v31 = vld [vmem:[#allocation21_spill] sm:$0xff] }
 0x184   : > { %v1151_v13 = vrot.slane %v1150_v38, 1 }
 0x185   : > { %v1073_v57 = vadd.f32 %v1072_v42, %v1058_v52  ;;  %v1110_v14 = vadd.f32 %v1109_v28, %v1095_v7  ;;  %v1141_v52 = vrot.slane %v1140_v48, 1  ;;  %v930_v53 = vadd.f32 %v929_v1, %v928_v0  ;;  %v4255_v0 = vld [vmem:[#allocation16_spill] sm:$0xff] }
 0x186   : > { %v1152_v51 = vadd.f32 %v1151_v13, %v1150_v38  ;;  %v4262_v38 = vld [vmem:[#allocation6_spill] sm:$0xff] }
 0x187   : > { %v1074_v25 = vadd.f32 %v1073_v57, %v1059_v29  ;;  %v1111_v2 = vadd.f32 %v1110_v14, %v1096_v26  ;;  %v1142_v32 = vadd.f32 %v1141_v52, %v1140_v48  ;;  %v4241_v14 = vld [vmem:[#allocation18_spill] sm:$0xff]  ;;  %v4258_v48 = vld [vmem:[#allocation3_spill] sm:$0xff] }
 0x188   : > { %v3232_v52 = vld [vmem:[%s4143_s2] sm:$0xff] }
 0x189   : > { %v1075_v9 = vrot.slane %v1074_v25, 4  ;;  %v1112_v36 = vadd.f32 %v1111_v2, %v1097_v60  ;;  %v4243_v60 = vld [vmem:[#allocation22_spill] sm:$0xff]  ;;  %v4246_v2 = vld [vmem:[#allocation7_spill] sm:$0xff] }
 0x18a   : > { %v1156_v45 = vld [vmem:[#allocation2] sm:$0x3] }
 0x18b   : > { %v1076_v35 = vadd.f32 %v1075_v9, %v1074_v25  ;;  %v1113_v62 = vrot.slane %v1112_v36, 4  ;;  %v4245_v25 = vld [vmem:[#allocation4_spill] sm:$0xff]  ;;  %v3199_v9 = vand.u32 127, %v4199_v49 }
 0x18d   : > { %v1077_v58 = vrot.slane %v1076_v35, 2  ;;  %v1114_v11 = vadd.f32 %v1113_v62, %v1112_v36  ;;  %v4253_v36 = vld [vmem:[#allocation14_spill] sm:$0xff]  ;;  %vm1168_vm3 = vcmp.ge.s32.totalorder %v3199_v9, 1  ;;  %v4254_v62 = vld [vmem:[#allocation15_spill] sm:$0xff]  ;;  %vm1173_vm4 = vcmp.ge.s32.totalorder %v3199_v9, 2 }
 0x18e   : > { %vm1178_vm5 = vcmp.ge.s32.totalorder %v3199_v9, 4  ;;  %vm1183_vm6 = vcmp.ge.s32.totalorder %v3199_v9, 8  ;;  %vm1188_vm7 = vcmp.ge.s32.totalorder %v3199_v9, 16  ;;  %vm1193_vm8 = vcmp.ge.s32.totalorder %v3199_v9, 32 }
 0x18f   : > { %v1078_v19 = vadd.f32 %v1077_v58, %v1076_v35  ;;  %v1115_v44 = vrot.slane %v1114_v11, 2  ;;  %v4256_v58 = vld [vmem:[#allocation17_spill] sm:$0xff]  ;;  %vm1198_vm9 = vcmp.ge.s32.totalorder %v3199_v9, 64 }
 0x191   : > { %v1079_v8 = vrot.slane %v1078_v19, 1  ;;  %v1116_v5 = vadd.f32 %v1115_v44, %v1114_v11  ;;  %v4257_v11 = vld [vmem:[#allocation19_spill] sm:$0xff] }
 0x192   : > { %v4261_v44 = vld [vmem:[#allocation23_spill] sm:$0xff] }
 0x193   : > { %v1080_v17 = vadd.f32 %v1079_v8, %v1078_v19  ;;  %v1117_v4 = vrot.slane %v1116_v5, 1  ;;  %v4260_v19 = vld [vmem:[#allocation5_spill] sm:$0xff] }
 0x195   : > { %v1081_v29 = vadd.f32 %v1080_v17, %v892_v10  ;;  %v1118_v7 = vadd.f32 %v1117_v4, %v1116_v5 }
 0x197   : > { %v1119_v42 = vadd.f32 %v1118_v7, %v930_v53  ;;  %v1143_v28 = vadd.f32 %v1142_v32, %v1081_v29 }
 0x199   : > { %v1153_v26 = vadd.f32 %v1152_v51, %v1119_v42 }
 0x19b   : > { %v1155_v23 = vsel %vm1154_vm1, %v1143_v28, %v1153_v26  ;;  %v4274_v28 = vld [vmem:[#allocation24_spill] sm:$0xff] }
 0x19c   : > { %1166 = vrot.lane.b32.xlu1 %v1155_v23, %s2551_s12  ;;  %v1158_v57 = vsel %vm1157_vm2, %v1155_v23, 0.0 }
 0x19d   : > { %1159 = vadd.xlane.f32.xlu0 %v1158_v57 }
 0x1b3   : > { %1404 = vperm.xlu0 %2407, %v2661_v15  }
 0x1b7   : > { %1416 = vperm.xlu0 %2407, %v2676_v18  }
 0x1bb   : > { %1424 = vperm.xlu0 %2407, %v2691_v21  }
 0x1bf   : > { %1432 = vperm.xlu0 %2407, %v2706_v24  }
 0x1c3   : > { %1440 = vperm.xlu0 %2407, %v2721_v27  }
 0x1c7   : > { %1448 = vperm.xlu0 %2407, %v2736_v30  }
 0x1cb   : > { %1456 = vperm.xlu0 %2407, %v2751_v33   ;;  %v4247_v33 = vld [vmem:[#allocation8_spill] sm:$0xff] }
 0x1cf   : > { %1852 = vperm.xlu0 %2407, %v2767_v37   ;;  %v4248_v37 = vld [vmem:[#allocation9_spill] sm:$0xff] }
 0x1d3   : > { %1864 = vperm.xlu0 %2407, %v2805_v46   ;;  %v4249_v46 = vld [vmem:[#allocation10_spill] sm:$0xff] }
 0x1d7   : > { %1872 = vperm.xlu0 %2407, %v2823_v50   ;;  %v4250_v50 = vld [vmem:[#allocation11_spill] sm:$0xff] }
 0x1db   : > { %1880 = vperm.xlu0 %2407, %v2841_v54   ;;  %v4251_v54 = vld [vmem:[#allocation12_spill] sm:$0xff] }
 0x1df   : > { %1888 = vperm.xlu0 %2407, %v4241_v14  }
 0x1e3   : > { %1896 = vperm.xlu0 %2407, %v4242_v59   ;;  %v4276_v59 = vld [vmem:[#allocation33_spill] sm:$0xff] }
 0x1e7   : > { %1904 = vperm.xlu0 %2407, %v4243_v60  }
 0x1eb   : > { %2412 = vset.pattern.permute.xlu0 %v4244_v3 }
 0x1ec   : > { %1265 = vperm.xlu0 %2412, %v4245_v25  }
 0x1f0   : > { %1300 = vperm.xlu0 %2412, %v4246_v2  }
 0x1f4   : > { %1310 = vperm.xlu0 %2412, %v4247_v33  }
 0x1f8   : > { %1320 = vperm.xlu0 %2412, %v4248_v37  }
 0x1fc   : > { %1330 = vperm.xlu0 %2412, %v4249_v46  }
 0x200   : > { %1340 = vperm.xlu0 %2412, %v4250_v50  }
 0x204   : > { %1721 = vperm.xlu0 %2412, %v4251_v54  }
 0x208   : > { %1736 = vperm.xlu0 %2412, %v4252_v20  }
 0x20c   : > { %1746 = vperm.xlu0 %2412, %v4253_v36  }
 0x20e   : > { %v1167_v40 = vpop.permute.xlu1 %1166 }
 0x20f   : > { %v1169_v22 = vsel %vm1168_vm3, %v1167_v40, 0.0 }
 0x210   : > { %v3203_v35 = vadd.f32 %v1169_v22, %v1155_v23  ;;  %1756 = vperm.xlu0 %2412, %v4254_v62   ;;  %v4275_v23 = vld [vmem:[#allocation31_spill] sm:$0xff] }
 0x212   : > { %1171 = vrot.lane.b32.xlu1 %v3203_v35, %s2552_s22 }
 0x214   : > { %1766 = vperm.xlu0 %2412, %v4255_v0  }
 0x216   : > { %1203 = vperm.xlu1 %2405, %v1156_v45  }
 0x218   : > { %1776 = vperm.xlu0 %2412, %v4256_v58  }
 0x21a   : > { %1270 = vperm.xlu1 %2405, %v2661_v15  }
 0x21c   : > { %1786 = vperm.xlu0 %2412, %v4257_v11  }
 0x21e   : > { %1275 = vperm.xlu1 %2405, %v4258_v48   ;;  %v3309_v48 = vld [vmem:[%s4143_s2 + $0x70] sm:$0xff] }
 0x220   : > { %1796 = vperm.xlu0 %2412, %v4259_v31  }
 0x222   : > { %1280 = vperm.xlu1 %2405, %v4260_v19  }
 0x224   : > { %2146 = vperm.xlu0 %2412, %v4261_v44  }
 0x226   : > { %1285 = vperm.xlu1 %2405, %v2676_v18   ;;  %v4200_v18 = vmov 2  }
 0x228   : > { %2416 = vset.pattern.permute.xlu0 %v4200_v18 }
 0x229   : > { %1480 = vperm.xlu0 %2416, %v3232_v52  }
 0x22a   : > { %1290 = vperm.xlu1 %2405, %v4262_v38   ;;  %v1160_v61 = vpop.xlane.xlu0 %1159 }
 0x22b   : > { %v1161_v1 = vadd.f32 %v1160_v61, %v1156_v45 }
 0x22d   : > { %1163 = vst.msk [vmem:[#allocation2] sm:$0x3] %vm207_vm0, %v1161_v1 }
 0x22e   : > { %1295 = vperm.xlu1 %2405, %v2691_v21  }
 0x232   : > { %1305 = vperm.xlu1 %2405, %v2706_v24   ;;  %v3220_v15 = vpop.permute.xlu0 %1404  ;;  %v3240_v24 = vld [vmem:[%s4143_s2 + $0x18] sm:$0xff] }
 0x233   : > { %1492 = vperm.xlu0 %2416, %v3240_v24  }
 0x236   : > { %1315 = vperm.xlu1 %2405, %v2721_v27   ;;  %v3223_v8 = vpop.permute.xlu0 %1416 }
 0x237   : > { %1500 = vperm.xlu0 %2416, %v4262_v38  }
 0x23a   : > { %1325 = vperm.xlu1 %2405, %v2736_v30   ;;  %v3226_v5 = vpop.permute.xlu0 %1424 }
 0x23b   : > { %1508 = vperm.xlu0 %2416, %v4246_v2   ;;  %v4277_v2 = vld [vmem:[#allocation35_spill] sm:$0xff] }
 0x23e   : > { %v3235_v21 = vpop.permute.xlu0 %1432 }
 0x23f   : > { %4263 = vst [vmem:[#allocation18_spill] sm:$0xff] %v3235_v21  ;;  %1516 = vperm.xlu0 %2416, %v4247_v33  }
 0x242   : > { %v3243_v27 = vpop.permute.xlu0 %1440 }
 0x243   : > { %4264 = vst [vmem:[#allocation20_spill] sm:$0xff] %v3243_v27  ;;  %1524 = vperm.xlu0 %2416, %v4248_v37  }
 0x246   : > { %v3246_v30 = vpop.permute.xlu0 %1448 }
 0x247   : > { %4265 = vst [vmem:[#allocation22_spill] sm:$0xff] %v3246_v30  ;;  %1532 = vperm.xlu0 %2416, %v4249_v46   ;;  %v4278_v46 = vld [vmem:[#allocation37_spill] sm:$0xff] }
 0x24a   : > { %v3249_v10 = vpop.permute.xlu0 %1456 }
 0x24b   : > { %4266 = vst [vmem:[#allocation4_spill] sm:$0xff] %v3249_v10  ;;  %1540 = vperm.xlu0 %2416, %v4250_v50   ;;  %v3507_v10 = vld [vmem:[%s4143_s2 + $0xf0] sm:$0xff] }
 0x24e   : > { %v3252_v17 = vpop.permute.xlu0 %1852 }
 0x24f   : > { %4267 = vst [vmem:[#allocation7_spill] sm:$0xff] %v3252_v17  ;;  %1928 = vperm.xlu0 %2416, %v4251_v54   ;;  %v3461_v17 = vld [vmem:[%s4143_s2 + $0xa0] sm:$0xff] }
 0x252   : > { %v3255_v4 = vpop.permute.xlu0 %1864 }
 0x253   : > { %4268 = vst [vmem:[#allocation8_spill] sm:$0xff] %v3255_v4  ;;  %1940 = vperm.xlu0 %2416, %v4252_v20   ;;  %v3455_v4 = vld [vmem:[%s4143_s2 + $0x90] sm:$0xff] }
 0x256   : > { %v3258_v13 = vpop.permute.xlu0 %1872 }
 0x257   : > { %4269 = vst [vmem:[#allocation9_spill] sm:$0xff] %v3258_v13  ;;  %1948 = vperm.xlu0 %2416, %v4253_v36  }
 0x25a   : > { %v3261_v53 = vpop.permute.xlu0 %1880 }
 0x25b   : > { %4270 = vst [vmem:[#allocation10_spill] sm:$0xff] %v3261_v53  ;;  %1956 = vperm.xlu0 %2416, %v4254_v62  }
 0x25e   : > { %v3264_v29 = vpop.permute.xlu0 %1888 }
 0x25f   : > { %4271 = vst [vmem:[#allocation11_spill] sm:$0xff] %v3264_v29  ;;  %1964 = vperm.xlu0 %2416, %v4255_v0  }
 0x262   : > { %v3267_v7 = vpop.permute.xlu0 %1896 }
 0x263   : > { %4272 = vst [vmem:[#allocation12_spill] sm:$0xff] %v3267_v7  ;;  %1972 = vperm.xlu0 %2416, %v4256_v58  }
 0x266   : > { %v3270_v32 = vpop.permute.xlu0 %1904 }
 0x267   : > { %4273 = vst [vmem:[#allocation13_spill] sm:$0xff] %v3270_v32  ;;  %1980 = vperm.xlu0 %2416, %v4257_v11  }
 0x26b   : > { %v1266_v42 = vpop.permute.xlu0 %1265  ;;  %1988 = vperm.xlu0 %2416, %v4259_v31   ;;  %v4279_v31 = vmov 1  }
 0x26c   : > { %v3274_v51 = vadd.f32 %v1266_v42, %v4274_v28  ;;  %v2498_v28 = vld [vmem:[%s4143_s2 + $0x48] sm:$0xff] }
 0x26f   : > { %v1301_v26 = vpop.permute.xlu0 %1300 }
 0x270   : > { %v3278_v57 = vadd.f32 %v1301_v26, %v4275_v23  ;;  %v2501_v26 = vld [vmem:[%s4143_s2 + $0x78] sm:$0xff]  ;;  %v3355_v23 = vld [vmem:[%s4143_s2 + $0x8] sm:$0xff] }
 0x273   : > { %v1311_v14 = vpop.permute.xlu0 %1310 }
 0x274   : > { %v3282_v60 = vadd.f32 %v1311_v14, %v4276_v59  ;;  %v3361_v14 = vld [vmem:[%s4143_s2 + $0x20] sm:$0xff] }
 0x277   : > { %v1321_v25 = vpop.permute.xlu0 %1320 }
 0x278   : > { %v3286_v33 = vadd.f32 %v1321_v25, %v4277_v2  ;;  %v3369_v25 = vld [vmem:[%s4143_s2 + $0x30] sm:$0xff] }
 0x27b   : > { %v1331_v37 = vpop.permute.xlu0 %1330 }
 0x27c   : > { %v3290_v50 = vadd.f32 %v1331_v37, %v4278_v46 }
 0x27f   : > { %v1341_v54 = vpop.permute.xlu0 %1340 }
 0x280   : > { %v3293_v20 = vadd.f32 %v1341_v54, %v3115_v16 }
 0x283   : > { %v1722_v36 = vpop.permute.xlu0 %1721 }
 0x284   : > { %v3297_v40 = vadd.f32 %v1722_v36, %v3128_v41  ;;  %v1172_v22 = vpop.permute.xlu1 %1171 }
 0x285   : > { %v1174_v62 = vsel %vm1173_vm4, %v1172_v22, 0.0 }
 0x286   : > { %v1175_v45 = vadd.f32 %v1174_v62, %v3203_v35 }
 0x287   : > { %v1737_v0 = vpop.permute.xlu0 %1736 }
 0x288   : > { %v3301_v58 = vadd.f32 %v1737_v0, %v3002_v34  ;;  %1176 = vrot.lane.b32.xlu1 %v1175_v45, %s2554_s28  ;;  %s2555_s28 = smov 8  }
 0x28b   : > { %v1747_v11 = vpop.permute.xlu0 %1746 }
 0x28c   : > { %v3304_v16 = vadd.f32 %v1747_v11, %v3018_v39  ;;  %1335 = vperm.xlu1 %2405, %v3309_v48   ;;  %v2495_v39 = vld [vmem:[%s4143_s2 + $0x10] sm:$0xff] }
 0x28f   : > { %v1757_v41 = vpop.permute.xlu0 %1756 }
 0x290   : > { %v3313_v35 = vadd.f32 %v1757_v41, %v3034_v6  ;;  %2406 = vset.pattern.permute.xlu1 %v4279_v31 }
 0x291   : > { %1400 = vperm.xlu1 %2406, %v3232_v52  }
 0x293   : > { %v1767_v34 = vpop.permute.xlu0 %1766 }
 0x294   : > { %v3318_v19 = vadd.f32 %v1767_v34, %v3052_v12  ;;  %v2496_v12 = vld [vmem:[%s4143_s2 + $0x28] sm:$0xff] }
 0x295   : > { %1408 = vperm.xlu1 %2406, %v2495_v39   ;;  %v3364_v59 = vpop.permute.xlu1 %1203 }
 0x297   : > { %v1777_v44 = vpop.permute.xlu0 %1776 }
 0x298   : > { %v3324_v38 = vadd.f32 %v1777_v44, %v3070_v43  ;;  %v2497_v43 = vld [vmem:[%s4143_s2 + $0x38] sm:$0xff] }
 0x299   : > { %1412 = vperm.xlu1 %2406, %v3240_v24   ;;  %v3372_v2 = vpop.permute.xlu1 %1270 }
 0x29b   : > { %v1787_v6 = vpop.permute.xlu0 %1786 }
 0x29c   : > { %v3328_v61 = vadd.f32 %v1787_v6, %v3088_v47  ;;  %v2499_v47 = vld [vmem:[%s4143_s2 + $0x58] sm:$0xff]  ;;  %v3394_v6 = vld [vmem:[%s4143_s2 + $0x40] sm:$0xff] }
 0x29d   : > { %1420 = vperm.xlu1 %2406, %v2496_v12   ;;  %v3374_v37 = vpop.permute.xlu1 %1275 }
 0x29f   : > { %v1797_v1 = vpop.permute.xlu0 %1796 }
 0x2a0   : > { %v3334_v42 = vadd.f32 %v1797_v1, %v3106_v56  ;;  %v2500_v56 = vld [vmem:[%s4143_s2 + $0x68] sm:$0xff]  ;;  %v3400_v1 = vld [vmem:[%s4143_s2 + $0x50] sm:$0xff] }
 0x2a1   : > { %1428 = vperm.xlu1 %2406, %v2497_v43   ;;  %v3376_v46 = vpop.permute.xlu1 %1280 }
 0x2a5   : > { %1436 = vperm.xlu1 %2406, %v2498_v28   ;;  %v3378_v54 = vpop.permute.xlu1 %1285 }
 0x2a9   : > { %1444 = vperm.xlu1 %2406, %v2499_v47   ;;  %v3380_v36 = vpop.permute.xlu1 %1290 }
 0x2ad   : > { %1452 = vperm.xlu1 %2406, %v2500_v56   ;;  %v3382_v22 = vpop.permute.xlu1 %1295 }
 0x2b1   : > { %1460 = vperm.xlu1 %2406, %v2501_v26   ;;  %v3384_v62 = vpop.permute.xlu1 %1305 }
 0x2b5   : > { %2408 = vset.pattern.permute.xlu1 %v4200_v18  ;;  %v3386_v0 = vpop.permute.xlu1 %1315 }
 0x2b6   : > { %1484 = vperm.xlu1 %2408, %v3355_v23  }
 0x2b9   : > { %v3388_v11 = vpop.permute.xlu1 %1325 }
 0x2ba   : > { %1488 = vperm.xlu1 %2408, %v2495_v39  }
 0x2be   : > { %1496 = vperm.xlu1 %2408, %v3361_v14  }
 0x2c2   : > { %1504 = vperm.xlu1 %2408, %v3369_v25  }
 0x2fa   : > { %v1177_v41 = vpop.permute.xlu1 %1176 }
 0x2fb   : > { %v1179_v34 = vsel %vm1178_vm5, %v1177_v41, 0.0  ;;  %v4202_v41 = vmov 3  }
 0x2fc   : > { %v1180_v44 = vadd.f32 %v1179_v34, %v1175_v45  ;;  %v3406_v45 = vld [vmem:[%s4143_s2 + $0x60] sm:$0xff] }
 0x2fe   : > { %1181 = vrot.lane.b32.xlu1 %v1180_v44, %s2555_s28 }
 0x302   : > { %1512 = vperm.xlu1 %2408, %v3394_v6  }
 0x306   : > { %1520 = vperm.xlu1 %2408, %v3400_v1  }
 0x30a   : > { %1528 = vperm.xlu1 %2408, %v3406_v45  }
 0x30b   : > { %v3413_v34 = vpop.permute.xlu1 %1335 }
 0x30e   : > { %1536 = vperm.xlu1 %2408, %v3309_v48  }
 0x310   : > { %v3415_v49 = vpop.permute.xlu1 %1400 }
 0x312   : > { %2409 = vset.pattern.permute.xlu1 %v4202_v41 }
 0x313   : > { %1576 = vperm.xlu1 %2409, %v3232_v52  }
 0x314   : > { %v3417_v18 = vpop.permute.xlu1 %1408 }
 0x317   : > { %1584 = vperm.xlu1 %2409, %v2495_v39  }
 0x318   : > { %v3419_v32 = vpop.permute.xlu1 %1412 }
 0x31b   : > { %1588 = vperm.xlu1 %2409, %v3240_v24   ;;  %v3427_v24 = vld [vmem:[%s4143_s2 + $0x88] sm:$0xff] }
 0x31c   : > { %v3422_v52 = vpop.permute.xlu1 %1420 }
 0x31f   : > { %1596 = vperm.xlu1 %2409, %v2496_v12  }
 0x320   : > { %v3430_v39 = vpop.permute.xlu1 %1428 }
 0x321   : > { %4280 = vst [vmem:[#allocation14_spill] sm:$0xff] %v3430_v39 }
 0x323   : > { %1604 = vperm.xlu1 %2409, %v2497_v43  }
 0x324   : > { %v3432_v12 = vpop.permute.xlu1 %1436 }
 0x325   : > { %4281 = vst [vmem:[#allocation15_spill] sm:$0xff] %v3432_v12 }
 0x327   : > { %1612 = vperm.xlu1 %2409, %v2498_v28  }
 0x328   : > { %v3434_v43 = vpop.permute.xlu1 %1444 }
 0x329   : > { %4282 = vst [vmem:[#allocation16_spill] sm:$0xff] %v3434_v43  ;;  %v2523_v43 = vld [vmem:[%s4143_s2 + $0x108] sm:$0xff] }
 0x32b   : > { %1620 = vperm.xlu1 %2409, %v2499_v47  }
 0x32c   : > { %v3436_v28 = vpop.permute.xlu1 %1452 }
 0x32d   : > { %4283 = vst [vmem:[#allocation17_spill] sm:$0xff] %v3436_v28  ;;  %v2515_v28 = vld [vmem:[%s4143_s2 + $0x80] sm:$0xff] }
 0x32f   : > { %1628 = vperm.xlu1 %2409, %v2500_v56  }
 0x330   : > { %v3438_v47 = vpop.permute.xlu1 %1460 }
 0x331   : > { %4284 = vst [vmem:[#allocation19_spill] sm:$0xff] %v3438_v47 }
 0x333   : > { %1636 = vperm.xlu1 %2409, %v2501_v26  }
 0x335   : > { %v3440_v56 = vpop.permute.xlu1 %1484 }
 0x336   : > { %4285 = vst [vmem:[#allocation3_spill] sm:$0xff] %v3440_v56  ;;  %v4292_v56 = vmov 3  }
 0x337   : > { %2410 = vset.pattern.permute.xlu1 %v4244_v3 }
 0x338   : > { %1726 = vperm.xlu1 %2410, %v3427_v24  }
 0x339   : > { %v3442_v26 = vpop.permute.xlu1 %1488 }
 0x33a   : > { %4286 = vst [vmem:[#allocation21_spill] sm:$0xff] %v3442_v26 }
 0x33d   : > { %v3444_v41 = vpop.permute.xlu1 %1496 }
 0x33e   : > { %4287 = vst [vmem:[#allocation5_spill] sm:$0xff] %v3444_v41  ;;  %v3483_v41 = vld [vmem:[%s4143_s2 + $0xd0] sm:$0xff] }
 0x341   : > { %v3446_v7 = vpop.permute.xlu1 %1504 }
 0x342   : > { %4288 = vst [vmem:[#allocation23_spill] sm:$0xff] %v3446_v7 }
 0x370   : > { %v1182_v29 = vpop.permute.xlu1 %1181 }
 0x371   : > { %v1184_v53 = vsel %vm1183_vm6, %v1182_v29, 0.0 }
 0x372   : > { %v3449_v13 = vadd.f32 %v1184_v53, %v1180_v44  ;;  %v3467_v53 = vld [vmem:[%s4143_s2 + $0xb0] sm:$0xff]  ;;  %v3475_v44 = vld [vmem:[%s4143_s2 + $0xc0] sm:$0xff] }
 0x374   : > { %1186 = vrot.lane.b32.xlu1 %v3449_v13, %s2557_s10 }
 0x378   : > { %1731 = vperm.xlu1 %2410, %v3455_v4  }
 0x37c   : > { %1741 = vperm.xlu1 %2410, %v3461_v17  }
 0x380   : > { %1751 = vperm.xlu1 %2410, %v3467_v53  }
 0x381   : > { %v3470_v29 = vpop.permute.xlu1 %1512 }
 0x382   : > { %4289 = vst [vmem:[#allocation6_spill] sm:$0xff] %v3470_v29  ;;  %v3489_v29 = vld [vmem:[%s4143_s2 + $0x100] sm:$0xff] }
 0x383   : > { %2166 = vperm.xlu0 %2416, %v3489_v29  }
 0x384   : > { %1761 = vperm.xlu1 %2410, %v3475_v44  }
 0x385   : > { %v3478_v7 = vpop.permute.xlu1 %1520 }
 0x386   : > { %4290 = vst [vmem:[#allocation24_spill] sm:$0xff] %v3478_v7  ;;  %v3497_v7 = vld [vmem:[%s4143_s2 + $0xe0] sm:$0xff] }
 0x387   : > { %2418 = vset.pattern.permute.xlu0 %v4292_v56 }
 0x388   : > { %1771 = vperm.xlu1 %2410, %v3483_v41   ;;  %1580 = vperm.xlu0 %2418, %v3355_v23  }
 0x389   : > { %v3491_v26 = vpop.permute.xlu1 %1528 }
 0x38a   : > { %4291 = vst [vmem:[#allocation31_spill] sm:$0xff] %v3491_v26 }
 0x38c   : > { %1781 = vperm.xlu1 %2410, %v3497_v7   ;;  %1592 = vperm.xlu0 %2418, %v3361_v14   ;;  %v2516_v14 = vld [vmem:[%s4143_s2 + $0x98] sm:$0xff] }
 0x38d   : > { %v3501_v47 = vpop.permute.xlu1 %1536 }
 0x38e   : > { %4293 = vst [vmem:[#allocation33_spill] sm:$0xff] %v3501_v47 }
 0x390   : > { %1791 = vperm.xlu1 %2410, %v3507_v10   ;;  %1600 = vperm.xlu0 %2418, %v3369_v25  }
 0x392   : > { %v3510_v26 = vpop.permute.xlu1 %1576 }
 0x393   : > { %4294 = vst [vmem:[#allocation35_spill] sm:$0xff] %v3510_v26 }
 0x394   : > { %2411 = vset.pattern.permute.xlu1 %v4279_v31  ;;  %1608 = vperm.xlu0 %2418, %v3394_v6   ;;  %v3542_v6 = vld [vmem:[%s4143_s2 + $0xb8] sm:$0xff] }
 0x395   : > { %1848 = vperm.xlu1 %2411, %v2515_v28  }
 0x396   : > { %v3517_v47 = vpop.permute.xlu1 %1584 }
 0x397   : > { %4295 = vst [vmem:[#allocation37_spill] sm:$0xff] %v3517_v47  ;;  %v3533_v47 = vld [vmem:[%s4143_s2 + $0xa8] sm:$0xff] }
 0x398   : > { %1616 = vperm.xlu0 %2418, %v3400_v1   ;;  %v2519_v1 = vld [vmem:[%s4143_s2 + $0xc8] sm:$0xff] }
 0x399   : > { %1856 = vperm.xlu1 %2411, %v3455_v4  }
 0x39a   : > { %v3521_v23 = vpop.permute.xlu1 %1588 }
 0x39b   : > { %4296 = vst [vmem:[#allocation39_spill] sm:$0xff] %v3521_v23 }
 0x39c   : > { %1624 = vperm.xlu0 %2418, %v3406_v45   ;;  %v2520_v45 = vld [vmem:[%s4143_s2 + $0xd8] sm:$0xff] }
 0x39d   : > { %1860 = vperm.xlu1 %2411, %v2516_v14  }
 0x39e   : > { %v3527_v26 = vpop.permute.xlu1 %1596 }
 0x39f   : > { %4297 = vst [vmem:[#allocation40_spill] sm:$0xff] %v3527_v26 }
 0x3a0   : > { %1632 = vperm.xlu0 %2418, %v3309_v48   ;;  %v2521_v48 = vld [vmem:[%s4143_s2 + $0xe8] sm:$0xff] }
 0x3a1   : > { %1868 = vperm.xlu1 %2411, %v3533_v47  }
 0x3a2   : > { %v3536_v25 = vpop.permute.xlu1 %1604 }
 0x3a3   : > { %4298 = vst [vmem:[#allocation41_spill] sm:$0xff] %v3536_v25 }
 0x3a4   : > { %2028 = vperm.xlu0 %2418, %v3427_v24  }
 0x3a5   : > { %1876 = vperm.xlu1 %2411, %v3542_v6  }
 0x3a6   : > { %v3545_v26 = vpop.permute.xlu1 %1612 }
 0x3a7   : > { %4299 = vst [vmem:[#allocation42_spill] sm:$0xff] %v3545_v26 }
 0x3a8   : > { %2040 = vperm.xlu0 %2418, %v3461_v17  }
 0x3a9   : > { %1884 = vperm.xlu1 %2411, %v2519_v1  }
 0x3aa   : > { %v3551_v23 = vpop.permute.xlu1 %1620 }
 0x3ab   : > { %4300 = vst [vmem:[#allocation43_spill] sm:$0xff] %v3551_v23 }
 0x3ac   : > { %2048 = vperm.xlu0 %2418, %v3467_v53  }
 0x3ad   : > { %1892 = vperm.xlu1 %2411, %v2520_v45  }
 0x3ae   : > { %v3557_v25 = vpop.permute.xlu1 %1628 }
 0x3af   : > { %4301 = vst [vmem:[#allocation44_spill] sm:$0xff] %v3557_v25  ;;  %v2522_v25 = vld [vmem:[%s4143_s2 + $0xf8] sm:$0xff] }
 0x3b0   : > { %2060 = vperm.xlu0 %2418, %v2519_v1  }
 0x3b1   : > { %1900 = vperm.xlu1 %2411, %v2521_v48  }
 0x3b2   : > { %v3563_v26 = vpop.permute.xlu1 %1636 }
 0x3b3   : > { %4302 = vst [vmem:[#allocation45_spill] sm:$0xff] %v3563_v26 }
 0x3b4   : > { %2068 = vperm.xlu0 %2418, %v2520_v45  }
 0x3b7   : > { %v1727_v23 = vpop.permute.xlu1 %1726 }
 0x3b8   : > { %v3567_v30 = vadd.f32 %v1727_v23, %v3134_v55  ;;  %2076 = vperm.xlu0 %2418, %v2521_v48   ;;  %v4303_v55 = vmov 2  }
 0x3bc   : > { %2084 = vperm.xlu0 %2418, %v2522_v25  }
 0x3c0   : > { %2182 = vperm.xlu0 %2418, %v2523_v43  }
 0x3e6   : > { %v1187_v26 = vpop.permute.xlu1 %1186 }
 0x3e7   : > { %v1189_v1 = vsel %vm1188_vm7, %v1187_v26, 0.0 }
 0x3e8   : > { %v1190_v27 = vadd.f32 %v1189_v1, %v3449_v13 }
 0x3ea   : > { %1191 = vrot.lane.b32.xlu1 %v1190_v27, %s2558_s26 }
 0x3ee   : > { %1908 = vperm.xlu1 %2411, %v2522_v25  }
 0x3f2   : > { %2413 = vset.pattern.permute.xlu1 %v4303_v55 }
 0x3f3   : > { %1932 = vperm.xlu1 %2413, %v3427_v24  }
 0x3f7   : > { %1936 = vperm.xlu1 %2413, %v3455_v4   ;;  %v3583_v23 = vpop.permute.xlu1 %1731 }
 0x3fb   : > { %1944 = vperm.xlu1 %2413, %v3461_v17   ;;  %v3587_v13 = vpop.permute.xlu1 %1741 }
 0x3ff   : > { %1952 = vperm.xlu1 %2413, %v3467_v53   ;;  %v3590_v26 = vpop.permute.xlu1 %1751 }
 0x403   : > { %1960 = vperm.xlu1 %2413, %v3475_v44   ;;  %v3593_v17 = vpop.permute.xlu1 %1761 }
 0x407   : > { %1968 = vperm.xlu1 %2413, %v3483_v41   ;;  %v3596_v24 = vpop.permute.xlu1 %1771 }
 0x40b   : > { %1976 = vperm.xlu1 %2413, %v3497_v7   ;;  %v3600_v53 = vpop.permute.xlu1 %1781 }
 0x40f   : > { %1984 = vperm.xlu1 %2413, %v3507_v10   ;;  %v3604_v25 = vpop.permute.xlu1 %1791 }
 0x413   : > { %2414 = vset.pattern.permute.xlu1 %v4292_v56 }
 0x414   : > { %2024 = vperm.xlu1 %2414, %v2515_v28   ;;  %v3606_v28 = vpop.permute.xlu1 %1848 }
 0x415   : > { %4304 = vst [vmem:[#allocation46_spill] sm:$0xff] %v3606_v28 }
 0x418   : > { %2032 = vperm.xlu1 %2414, %v3455_v4   ;;  %v3608_v45 = vpop.permute.xlu1 %1856 }
 0x419   : > { %4305 = vst [vmem:[#allocation47_spill] sm:$0xff] %v3608_v45  ;;  %v3623_v45 = vpop.permute.xlu0 %2146 }
 0x41c   : > { %2036 = vperm.xlu1 %2414, %v2516_v14   ;;  %v3610_v4 = vpop.permute.xlu1 %1860 }
 0x41d   : > { %4306 = vst [vmem:[#allocation48_spill] sm:$0xff] %v3610_v4  ;;  %v3625_v4 = vpop.permute.xlu0 %1480 }
 0x420   : > { %2415 = vset.pattern.permute.xlu1 %v4244_v3  ;;  %v3612_v14 = vpop.permute.xlu1 %1868 }
 0x421   : > { %2141 = vperm.xlu1 %2415, %v3489_v29   ;;  %4307 = vst [vmem:[#allocation49_spill] sm:$0xff] %v3612_v14 }
 0x424   : > { %v3614_v48 = vpop.permute.xlu1 %1876 }
 0x425   : > { %2417 = vset.pattern.permute.xlu1 %v4279_v31  ;;  %4308 = vst [vmem:[#allocation50_spill] sm:$0xff] %v3614_v48  ;;  %v3629_v48 = vpop.permute.xlu0 %1492 }
 0x426   : > { %2156 = vperm.xlu1 %2417, %v3489_v29  }
 0x428   : > { %v3616_v3 = vpop.permute.xlu1 %1884 }
 0x429   : > { %4309 = vst [vmem:[#allocation51_spill] sm:$0xff] %v3616_v3 }
 0x42c   : > { %v3618_v1 = vpop.permute.xlu1 %1892 }
 0x42d   : > { %4310 = vst [vmem:[#allocation52_spill] sm:$0xff] %v3618_v1 }
 0x430   : > { %v3620_v12 = vpop.permute.xlu1 %1900 }
 0x431   : > { %4311 = vst [vmem:[#allocation53_spill] sm:$0xff] %v3620_v12 }
 0x45c   : > { %v1192_v31 = vpop.permute.xlu1 %1191 }
 0x45d   : > { %v1194_v21 = vsel %vm1193_vm8, %v1192_v31, 0.0  ;;  %v3633_v31 = vpop.permute.xlu0 %1500 }
 0x45e   : > { %v1195_v39 = vadd.f32 %v1194_v21, %v1190_v27 }
 0x460   : > { %1196 = vrot.lane.b32.xlu1 %v1195_v39, %s2559_s27 }
 0x461   : > { %v3636_v21 = vpop.permute.xlu0 %1508 }
 0x464   : > { %2160 = vperm.xlu1 %2417, %v2523_v43  }
 0x465   : > { %v3640_v27 = vpop.permute.xlu0 %1516 }
 0x466   : > { %4312 = vst [vmem:[#allocation54_spill] sm:$0xff] %v3640_v27  ;;  %v4342_v27 = vlaneseq }
 0x468   : > { %2419 = vset.pattern.permute.xlu1 %v4303_v55 }
 0x469   : > { %2170 = vperm.xlu1 %2419, %v2523_v43  }
 0x46d   : > { %2420 = vset.pattern.permute.xlu1 %v4292_v56  ;;  %v3642_v43 = vpop.permute.xlu1 %1908  ;;  %v3645_v56 = vpop.permute.xlu0 %1524 }
 0x46e   : > { %2044 = vperm.xlu1 %2420, %v3533_v47   ;;  %4313 = vst [vmem:[#allocation55_spill] sm:$0xff] %v3642_v43  ;;  %4314 = vst [vmem:[#allocation56_spill] sm:$0xff] %v3645_v56 }
 0x472   : > { %2052 = vperm.xlu1 %2420, %v3542_v6   ;;  %v3647_v47 = vpop.permute.xlu1 %1932  ;;  %v3650_v6 = vpop.permute.xlu0 %1532 }
 0x473   : > { %4315 = vst [vmem:[#allocation57_spill] sm:$0xff] %v3647_v47  ;;  %4316 = vst [vmem:[#allocation58_spill] sm:$0xff] %v3650_v6 }
 0x476   : > { %2056 = vperm.xlu1 %2420, %v3475_v44   ;;  %v3652_v44 = vpop.permute.xlu1 %1936  ;;  %v3654_v55 = vpop.permute.xlu0 %1540 }
 0x477   : > { %4317 = vst [vmem:[#allocation59_spill] sm:$0xff] %v3652_v44  ;;  %4318 = vst [vmem:[#allocation60_spill] sm:$0xff] %v3654_v55 }
 0x47a   : > { %2064 = vperm.xlu1 %2420, %v3483_v41   ;;  %v3656_v41 = vpop.permute.xlu1 %1944 }
 0x47b   : > { %4319 = vst [vmem:[#allocation61_spill] sm:$0xff] %v3656_v41 }
 0x47e   : > { %2072 = vperm.xlu1 %2420, %v3497_v7   ;;  %v3658_v7 = vpop.permute.xlu0 %1928  ;;  %v3660_v14 = vpop.permute.xlu1 %1952 }
 0x47f   : > { %4320 = vst [vmem:[#allocation62_spill] sm:$0xff] %v3658_v7  ;;  %4321 = vst [vmem:[#allocation63_spill] sm:$0xff] %v3660_v14 }
 0x482   : > { %2080 = vperm.xlu1 %2420, %v3507_v10   ;;  %v3662_v43 = vpop.permute.xlu0 %1940  ;;  %v3664_v10 = vpop.permute.xlu1 %1960 }
 0x483   : > { %4322 = vst [vmem:[#allocation64_spill] sm:$0xff] %v3662_v43  ;;  %4323 = vst [vmem:[#allocation65_spill] sm:$0xff] %v3664_v10  ;;  %v1210_v10 = vcvt.s32.f32 %v3199_v9  ;;  %v3706_v9 = vshrl.u32 %v4342_v27, 7  ;;  %v4345_v27 = vld [vmem:[#allocation27_spill] sm:$0xff] }
 0x486   : > { %2178 = vperm.xlu1 %2420, %v3489_v29   ;;  %v3666_v12 = vpop.permute.xlu0 %1948  ;;  %v3668_v47 = vpop.permute.xlu1 %1968 }
 0x487   : > { %4324 = vst [vmem:[#allocation66_spill] sm:$0xff] %v3666_v12  ;;  %4325 = vst [vmem:[#allocation67_spill] sm:$0xff] %v3668_v47 }
 0x48a   : > { %v3670_v29 = vpop.permute.xlu0 %1956  ;;  %v3672_v1 = vpop.permute.xlu1 %1976 }
 0x48b   : > { %4326 = vst [vmem:[#allocation68_spill] sm:$0xff] %v3670_v29  ;;  %4327 = vst [vmem:[#allocation69_spill] sm:$0xff] %v3672_v1  ;;  %v1211_v29 = vadd.f32 1.0, %v1210_v10 }
 0x48d   : > { %v1212_v1 = vmul.f32 272.0, %v1211_v29 }
 0x48e   : > { %v3674_v44 = vpop.permute.xlu0 %1964  ;;  %v3676_v3 = vpop.permute.xlu1 %1984 }
 0x48f   : > { %4328 = vst [vmem:[#allocation70_spill] sm:$0xff] %v3674_v44  ;;  %4329 = vst [vmem:[#allocation71_spill] sm:$0xff] %v3676_v3  ;;  %2488 = vrcp.f32 %v1212_v1 }
 0x492   : > { %v3678_v41 = vpop.permute.xlu0 %1972 }
 0x493   : > { %4330 = vst [vmem:[#allocation72_spill] sm:$0xff] %v3678_v41  ;;  %v3680_v7 = vpop.permute.xlu1 %2024 }
 0x494   : > { %4331 = vst [vmem:[#allocation73_spill] sm:$0xff] %v3680_v7 }
 0x496   : > { %v3682_v14 = vpop.permute.xlu0 %1980 }
 0x497   : > { %4332 = vst [vmem:[#allocation74_spill] sm:$0xff] %v3682_v14  ;;  %v3684_v43 = vpop.permute.xlu1 %2032 }
 0x498   : > { %4333 = vst [vmem:[#allocation75_spill] sm:$0xff] %v3684_v43 }
 0x49a   : > { %v3687_v12 = vpop.permute.xlu0 %1988 }
 0x49b   : > { %4334 = vst [vmem:[#allocation76_spill] sm:$0xff] %v3687_v12  ;;  %v3689_v47 = vpop.permute.xlu1 %2036  ;;  %v2489_v12 = vpop.eup %2488 }
 0x49c   : > { %4335 = vst [vmem:[#allocation77_spill] sm:$0xff] %v3689_v47 }
 0x49e   : > { %v3691_v28 = vpop.permute.xlu0 %2166 }
 0x49f   : > { %4336 = vst [vmem:[#allocation78_spill] sm:$0xff] %v3691_v28 }
 0x4a0   : > { %v2142_v44 = vpop.permute.xlu1 %2141 }
 0x4a2   : > { %v3693_v3 = vpop.permute.xlu0 %1580 }
 0x4a3   : > { %4337 = vst [vmem:[#allocation79_spill] sm:$0xff] %v3693_v3 }
 0x4a5   : > { %v3695_v41 = vpop.permute.xlu1 %2156 }
 0x4a6   : > { %4338 = vst [vmem:[#allocation80_spill] sm:$0xff] %v3695_v41  ;;  %v3698_v7 = vpop.permute.xlu0 %1592 }
 0x4a7   : > { %4339 = vst [vmem:[#allocation81_spill] sm:$0xff] %v3698_v7 }
 0x4aa   : > { %v3701_v10 = vpop.permute.xlu0 %1600 }
 0x4ab   : > { %4340 = vst [vmem:[#allocation82_spill] sm:$0xff] %v3701_v10  ;;  %v4343_v10 = vld [vmem:[#allocation25_spill] sm:$0xff] }
 0x4ae   : > { %v3703_v1 = vpop.permute.xlu0 %1608 }
 0x4af   : > { %4341 = vst [vmem:[#allocation83_spill] sm:$0xff] %v3703_v1  ;;  %v4344_v1 = vld [vmem:[#allocation26_spill] sm:$0xff] }
 0x4d2   : > { %v1197_v43 = vpop.permute.xlu1 %1196 }
 0x4d3   : > { %v1199_v14 = vsel %vm1198_vm9, %v1197_v43, 0.0 }
 0x4d4   : > { %v1200_v55 = vadd.f32 %v1199_v14, %v1195_v39  ;;  %v3708_v39 = vpop.permute.xlu0 %1616 }
 0x4d6   : > { %v1206_v47 = vadd.f32 %v3364_v59, %v1200_v55  ;;  %v1361_v59 = vsub.s32 0, %v3706_v9 }
 0x4d8   : > { %v1215_v29 = vmul.f32 %v2489_v12, %v1206_v47 }
 0x4da   : > { %v1216_v28 = vmul.f32 2.0, %v1215_v29  ;;  %v1223_v56 = vmul.f32 %v1215_v29, %v1215_v29 }
 0x4dc   : > { %v1217_v6 = vmul.f32 %v1216_v28, %v1206_v47  ;;  %v1225_v43 = vrot.slane %v1223_v56, 7  ;;  %v3713_v28 = vadd.f32 %v3372_v2, %v4343_v10  ;;  %v3725_v56 = vadd.f32 %v3623_v45, %v3117_v63  ;;  %v4348_v10 = vld [vmem:[#allocation30_spill] sm:$0xff]  ;;  %v4349_v45 = vld [vmem:[#allocation32_spill] sm:$0xff] }
 0x4dd   : > { %v3742_v63 = vrot.slane %v1215_v29, %v1361_v59  ;;  %v1693_v29 = vld [vmem:[%s2987_s21 + $0xb0] sm:$0xff]  ;;  %v1695_v59 = vld [vmem:[%s2987_s21 + $0xc0] sm:$0xff] }
 0x4de   : > { %v1219_v3 = vrot.slane %v1217_v6, 7 }
 0x4e0   : > { %v1221_v41 = vsub.f32 %v1206_v47, %v1219_v3  ;;  %v3717_v3 = vadd.f32 %v3374_v37, %v4344_v1  ;;  %v4346_v47 = vld [vmem:[#allocation28_spill] sm:$0xff]  ;;  %v3737_v37 = vadd.f32 %v3382_v22, %v4348_v10  ;;  %v1699_v10 = vld [vmem:[%s2987_s21 + $0xe0] sm:$0xff] }
 0x4e1   : > { %v3729_v2 = vadd.f32 %v3378_v54, %v4346_v47  ;;  %v1689_v1 = vld [vmem:[%s2987_s21 + $0x90] sm:$0xff]  ;;  %v3746_v54 = vadd.f32 %v3384_v62, %v4349_v45 }
 0x4e2   : > { %v1222_v7 = vmul.f32 %v2489_v12, %v1221_v41  ;;  %v3721_v12 = vadd.f32 %v3376_v46, %v4345_v27  ;;  %v4347_v41 = vld [vmem:[#allocation29_spill] sm:$0xff]  ;;  %v3740_v46 = vpop.permute.xlu0 %1624  ;;  %v3764_v47 = vadd.f32 %v3583_v23, %v1689_v1  ;;  %v1381_v1 = vsub.s32 1, %v3706_v9 }
 0x4e3   : > { %v1701_v45 = vld [vmem:[%s2987_s21 + $0xf0] sm:$0xff] }
 0x4e4   : > { %v1227_v14 = vadd.f32 %v1225_v43, %v1222_v7  ;;  %v3733_v7 = vadd.f32 %v3380_v36, %v4347_v41  ;;  %v4350_v43 = vld [vmem:[#allocation34_spill] sm:$0xff]  ;;  %v3773_v41 = vadd.f32 %v3593_v17, %v1695_v59  ;;  %v3785_v23 = vadd.f32 %v3604_v25, %v1701_v45  ;;  %v3857_v59 = vpop.permute.xlu1 %2160 }
 0x4e5   : > { %v3750_v36 = vadd.f32 %v3386_v0, %v4350_v43  ;;  %v3770_v0 = vadd.f32 %v3590_v26, %v1693_v29  ;;  %v3782_v43 = vadd.f32 %v3600_v53, %v1699_v10  ;;  %v1363_v17 = vsub.f32 %v3274_v51, %v3742_v63  ;;  %4354 = vst [vmem:[#allocation26_spill] sm:$0xff] %v3857_v59 }
 0x4e6   : > { %v1228_v55 = vmax.f32 %v1227_v14, 0.0  ;;  %v4351_v14 = vld [vmem:[#allocation36_spill] sm:$0xff]  ;;  %v1366_v53 = vsub.f32 %v3721_v12, %v3742_v63  ;;  %v1367_v25 = vsub.f32 %v3729_v2, %v3742_v63  ;;  %v1368_v9 = vsub.f32 %v3733_v7, %v3742_v63 }
 0x4e7   : > { %v3754_v22 = vadd.f32 %v3388_v11, %v4351_v14  ;;  %v1697_v11 = vld [vmem:[%s2987_s21 + $0xd0] sm:$0xff]  ;;  %v1364_v14 = vsub.f32 %v3713_v28, %v3742_v63  ;;  %v1370_v51 = vsub.f32 %v3278_v57, %v3742_v63  ;;  %v1371_v28 = vsub.f32 %v3746_v54, %v3742_v63 }
 0x4e8   : > { %v1229_v6 = vadd.f32 1e-05, %v1228_v55  ;;  %v4352_v55 = vld [vmem:[#allocation38_spill] sm:$0xff]  ;;  %v1373_v12 = vsub.f32 %v3750_v36, %v3742_v63  ;;  %v1374_v2 = vsub.f32 %v3286_v33, %v3742_v63  ;;  %v1378_v54 = vsub.f32 %v3293_v20, %v3742_v63 }
 0x4e9   : > { %v3758_v27 = vadd.f32 %v3413_v34, %v4352_v55  ;;  %v3779_v34 = vadd.f32 %v3596_v24, %v1697_v11  ;;  %v1365_v24 = vsub.f32 %v3717_v3, %v3742_v63  ;;  %v3805_v55 = vpop.permute.xlu0 %1632  ;;  %v1372_v3 = vsub.f32 %v3282_v60, %v3742_v63  ;;  %v3893_v60 = vpop.permute.xlu1 %2170 }
 0x4ea   : > { %2490 = vrsqrt.f32 %v1229_v6  ;;  %v1691_v6 = vld [vmem:[%s2987_s21 + $0xa0] sm:$0xff]  ;;  %v1375_v7 = vsub.f32 %v3754_v22, %v3742_v63  ;;  %4356 = vst [vmem:[#allocation27_spill] sm:$0xff] %v3893_v60  ;;  %v4366_v60 = vld [vmem:[#allocation21_spill] sm:$0xff] }
 0x4eb   : > { %v3767_v62 = vadd.f32 %v3587_v13, %v1691_v6  ;;  %v2135_v13 = vld [vmem:[%s2987_s21 + $0x100] sm:$0xff]  ;;  %v1377_v57 = vsub.f32 %v3758_v27, %v3742_v63 }
 0x4ec   : > { %v3789_v26 = vadd.f32 %v2142_v44, %v2135_v13  ;;  %v1369_v44 = vsub.f32 %v3737_v37, %v3742_v63  ;;  %v1376_v37 = vsub.f32 %v3290_v50, %v3742_v63 }
 0x4ed   : > { %v3855_v27 = vpop.permute.xlu0 %2028 }
 0x4ee   : > { %4353 = vst [vmem:[#allocation25_spill] sm:$0xff] %v3789_v26  ;;  %v4362_v26 = vld [vmem:[#allocation17_spill] sm:$0xff] }
 0x4f1   : > { %v3887_v36 = vpop.permute.xlu0 %2040 }
 0x4f4   : > { %v2491_v6 = vpop.eup %2490 }
 0x4f5   : > { %v3847_v45 = vrot.slane %v2491_v6, %v1381_v1 }
 0x4f7   : > { %v1383_v20 = vmul.f32 %v3847_v45, %v1363_v17  ;;  %v1384_v29 = vmul.f32 %v3847_v45, %v1364_v14  ;;  %v1385_v10 = vmul.f32 %v3847_v45, %v1365_v24  ;;  %v1386_v50 = vmul.f32 %v3847_v45, %v1366_v53 }
 0x4f8   : > { %v1387_v22 = vmul.f32 %v3847_v45, %v1367_v25  ;;  %v1388_v11 = vmul.f32 %v3847_v45, %v1368_v9  ;;  %v1389_v1 = vmul.f32 %v3847_v45, %v1369_v44  ;;  %v1390_v33 = vmul.f32 %v3847_v45, %v1370_v51 }
 0x4f9   : > { %v1391_v6 = vmul.f32 %v3847_v45, %v1371_v28  ;;  %v1392_v13 = vmul.f32 %v3847_v45, %v1372_v3  ;;  %v1393_v17 = vmul.f32 %v3847_v45, %v1373_v12  ;;  %v1394_v14 = vmul.f32 %v3847_v45, %v1374_v2 }
 0x4fa   : > { %v1395_v24 = vmul.f32 %v3847_v45, %v1375_v7  ;;  %v1396_v53 = vmul.f32 %v3847_v45, %v1376_v37  ;;  %v1397_v25 = vmul.f32 %v3847_v45, %v1377_v57  ;;  %v1398_v9 = vmul.f32 %v3847_v45, %v1378_v54  ;;  %v4355_v37 = vld [vmem:[#allocation14_spill] sm:$0xff] }
 0x4fb   : > { %v1463_v44 = vmul.f32 %v3415_v49, %v1383_v20  ;;  %v1464_v51 = vmul.f32 %v3220_v15, %v1384_v29  ;;  %v1465_v28 = vmul.f32 %v3417_v18, %v1385_v10  ;;  %v1466_v3 = vmul.f32 %v3419_v32, %v1386_v50  ;;  %v4357_v54 = vld [vmem:[#allocation18_spill] sm:$0xff]  ;;  %v4358_v20 = vld [vmem:[#allocation15_spill] sm:$0xff]  ;;  %v4359_v29 = vld [vmem:[#allocation20_spill] sm:$0xff] }
 0x4fc   : > { %v1467_v12 = vmul.f32 %v3223_v8, %v1387_v22  ;;  %v1468_v2 = vmul.f32 %v3422_v52, %v1388_v11  ;;  %v1469_v7 = vmul.f32 %v3226_v5, %v1389_v1  ;;  %v1470_v57 = vmul.f32 %v4355_v37, %v1390_v33  ;;  %v4360_v10 = vld [vmem:[#allocation16_spill] sm:$0xff]  ;;  %v4361_v50 = vld [vmem:[#allocation22_spill] sm:$0xff]  ;;  %v4364_v11 = vld [vmem:[#allocation19_spill] sm:$0xff] }
 0x4fd   : > { %v1471_v49 = vmul.f32 %v4357_v54, %v1391_v6  ;;  %v1472_v15 = vmul.f32 %v4358_v20, %v1392_v13  ;;  %v1473_v18 = vmul.f32 %v4359_v29, %v1393_v17  ;;  %v1474_v32 = vmul.f32 %v4360_v10, %v1394_v14  ;;  %v4363_v22 = vld [vmem:[#allocation4_spill] sm:$0xff]  ;;  %v4365_v1 = vld [vmem:[#allocation3_spill] sm:$0xff]  ;;  %v4367_v54 = vld [vmem:[#allocation5_spill] sm:$0xff] }
 0x4fe   : > { %v1475_v59 = vmul.f32 %v4361_v50, %v1395_v24  ;;  %v1476_v8 = vmul.f32 %v4362_v26, %v1396_v53  ;;  %v1477_v52 = vmul.f32 %v4363_v22, %v1397_v25  ;;  %v1478_v5 = vmul.f32 %v4364_v11, %v1398_v9  ;;  %v4368_v20 = vld [vmem:[#allocation23_spill] sm:$0xff]  ;;  %v4369_v53 = vld [vmem:[#allocation6_spill] sm:$0xff]  ;;  %v4371_v10 = vld [vmem:[#allocation24_spill] sm:$0xff]  ;;  %v3915_v50 = vpop.permute.xlu0 %2048  ;;  %v3921_v22 = vpop.permute.xlu1 %2044 }
 0x4ff   : > { %v1543_v33 = vadd.f32 %v3625_v4, %v1463_v44  ;;  %v1544_v37 = vadd.f32 %v4365_v1, %v1464_v51  ;;  %v1545_v6 = vadd.f32 %v4366_v60, %v1465_v28  ;;  %v1546_v13 = vadd.f32 %v3629_v48, %v1466_v3  ;;  %v4370_v29 = vld [vmem:[#allocation54_spill] sm:$0xff]  ;;  %v4372_v44 = vld [vmem:[#allocation56_spill] sm:$0xff]  ;;  %v4373_v60 = vld [vmem:[#allocation31_spill] sm:$0xff] }
 0x500   : > { %v1547_v17 = vadd.f32 %v4367_v54, %v1467_v12  ;;  %v1548_v14 = vadd.f32 %v3633_v31, %v1468_v2  ;;  %v1549_v24 = vadd.f32 %v4368_v20, %v1469_v7  ;;  %v1550_v26 = vadd.f32 %v3636_v21, %v1470_v57  ;;  %v4374_v28 = vld [vmem:[#allocation58_spill] sm:$0xff]  ;;  %v4375_v12 = vld [vmem:[#allocation33_spill] sm:$0xff]  ;;  %v4376_v2 = vld [vmem:[#allocation60_spill] sm:$0xff] }
 0x501   : > { %v1551_v25 = vadd.f32 %v4369_v53, %v1471_v49  ;;  %v1552_v9 = vadd.f32 %v4370_v29, %v1472_v15  ;;  %v1553_v4 = vadd.f32 %v4371_v10, %v1473_v18  ;;  %v1554_v51 = vadd.f32 %v4372_v44, %v1474_v32  ;;  %v4377_v21 = vld [vmem:[#allocation35_spill] sm:$0xff]  ;;  %v4379_v15 = vld [vmem:[#allocation37_spill] sm:$0xff]  ;;  %v4382_v1 = vld [vmem:[#allocation40_spill] sm:$0xff] }
 0x502   : > { %v1555_v48 = vadd.f32 %v4373_v60, %v1475_v59  ;;  %v1556_v3 = vadd.f32 %v4374_v28, %v1476_v8  ;;  %v1557_v31 = vadd.f32 %v4375_v12, %v1477_v52  ;;  %v1558_v7 = vadd.f32 %v4376_v2, %v1478_v5  ;;  %v4378_v57 = vld [vmem:[#allocation79_spill] sm:$0xff]  ;;  %v3927_v52 = vpop.permute.xlu0 %2060  ;;  %v4381_v11 = vld [vmem:[#allocation81_spill] sm:$0xff]  ;;  %v4383_v20 = vld [vmem:[#allocation82_spill] sm:$0xff]  ;;  %v3933_v44 = vpop.permute.xlu1 %2052 }
 0x503   : > { %vm1559_vm10 = vcmp.ge.f32.partialorder %v1543_v33, 0.0  ;;  %vm1560_vm11 = vcmp.ge.f32.partialorder %v1544_v37, 0.0  ;;  %vm1561_vm12 = vcmp.ge.f32.partialorder %v1545_v6, 0.0  ;;  %vm1562_vm13 = vcmp.ge.f32.partialorder %v1546_v13, 0.0  ;;  %v4380_v32 = vld [vmem:[#allocation39_spill] sm:$0xff]  ;;  %v4384_v29 = vld [vmem:[#allocation41_spill] sm:$0xff] }
 0x504   : > { %vm1563_vm14 = vcmp.ge.f32.partialorder %v1547_v17, 0.0  ;;  %vm1564_vm15 = vcmp.ge.f32.partialorder %v1548_v14, 0.0  ;;  %vm1565_vm0 = vcmp.ge.f32.partialorder %v1549_v24, 0.0  ;;  %vm1566_vm1 = vcmp.ge.f32.partialorder %v1550_v26, 0.0  ;;  %4385 = vst [vmem:[#allocation28_spill] sm:$0xff] %v3933_v44  ;;  %v4386_v60 = vld [vmem:[#allocation83_spill] sm:$0xff] }
 0x505   : > { %vm1567_vm2 = vcmp.ge.f32.partialorder %v1551_v25, 0.0  ;;  %vm1568_vm3 = vcmp.ge.f32.partialorder %v1552_v9, 0.0  ;;  %vm1569_vm4 = vcmp.ge.f32.partialorder %v1553_v4, 0.0  ;;  %vm1570_vm5 = vcmp.ge.f32.partialorder %v1554_v51, 0.0  ;;  %v4387_v12 = vld [vmem:[#allocation42_spill] sm:$0xff] }
 0x506   : > { %vm1571_vm6 = vcmp.ge.f32.partialorder %v1555_v48, 0.0  ;;  %vm1572_vm7 = vcmp.ge.f32.partialorder %v1556_v3, 0.0  ;;  %vm1573_vm8 = vcmp.ge.f32.partialorder %v1557_v31, 0.0  ;;  %vm1574_vm9 = vcmp.ge.f32.partialorder %v1558_v7, 0.0 }
 0x507   : > { %v1639_v59 = vmul.f32 %v4377_v21, %v1543_v33  ;;  %v1640_v49 = vmul.f32 %v4378_v57, %v1544_v37  ;;  %v1641_v18 = vmul.f32 %v4379_v15, %v1545_v6  ;;  %v1642_v8 = vmul.f32 %v4380_v32, %v1546_v13  ;;  %v4388_v57 = vld [vmem:[#allocation43_spill] sm:$0xff] }
 0x508   : > { %v1643_v5 = vmul.f32 %v4381_v11, %v1547_v17  ;;  %v1644_v54 = vmul.f32 %v4382_v1, %v1548_v14  ;;  %v1645_v53 = vmul.f32 %v4383_v20, %v1549_v24  ;;  %v1646_v10 = vmul.f32 %v4384_v29, %v1550_v26  ;;  %v4389_v11 = vld [vmem:[#allocation44_spill] sm:$0xff]  ;;  %v4390_v29 = vld [vmem:[#allocation45_spill] sm:$0xff] }
 0x509   : > { %v1647_v28 = vmul.f32 %v4386_v60, %v1551_v25  ;;  %v1648_v2 = vmul.f32 %v4387_v12, %v1552_v9  ;;  %v1649_v21 = vmul.f32 %v3708_v39, %v1553_v4  ;;  %v1650_v15 = vmul.f32 %v4388_v57, %v1554_v51 }
 0x50a   : > { %v1651_v32 = vmul.f32 %v3740_v46, %v1555_v48  ;;  %v1652_v1 = vmul.f32 %v4389_v11, %v1556_v3  ;;  %v1653_v20 = vmul.f32 %v3805_v55, %v1557_v31  ;;  %v1654_v44 = vmul.f32 %v4390_v29, %v1558_v7 }
 0x50b   : > { %v1655_v60 = vsel %vm1559_vm10, %v1543_v33, %v1639_v59  ;;  %v1656_v12 = vsel %vm1560_vm11, %v1544_v37, %v1640_v49  ;;  %v1657_v39 = vsel %vm1561_vm12, %v1545_v6, %v1641_v18  ;;  %v1658_v57 = vsel %vm1562_vm13, %v1546_v13, %v1642_v8 }
 0x50c   : > { %v1659_v46 = vsel %vm1563_vm14, %v1547_v17, %v1643_v5  ;;  %v1660_v11 = vsel %vm1564_vm15, %v1548_v14, %v1644_v54  ;;  %v1661_v55 = vsel %vm1565_vm0, %v1549_v24, %v1645_v53  ;;  %v1662_v29 = vsel %vm1566_vm1, %v1550_v26, %v1646_v10  ;;  %1671 = vst [vmem:[%s2987_s21] sm:$0xff] %v1655_v60  ;;  %v3963_v17 = vpop.permute.xlu0 %2068  ;;  %v4406_v60 = vld [vmem:[#allocation9_spill] sm:$0xff] }
 0x50d   : > { %1672 = vst [vmem:[%s2987_s21 + $0x8] sm:$0xff] %v1656_v12  ;;  %1673 = vst [vmem:[%s2987_s21 + $0x10] sm:$0xff] %v1657_v39  ;;  %v1663_v33 = vsel %vm1567_vm2, %v1551_v25, %v1647_v28  ;;  %v1664_v37 = vsel %vm1568_vm3, %v1552_v9, %v1648_v2  ;;  %v1665_v6 = vsel %vm1569_vm4, %v1553_v4, %v1649_v21  ;;  %v3973_v9 = vpop.permute.xlu1 %2056  ;;  %v4402_v2 = vld [vmem:[#allocation7_spill] sm:$0xff] }
 0x50e   : > { %1674 = vst [vmem:[%s2987_s21 + $0x18] sm:$0xff] %v1658_v57  ;;  %v1666_v13 = vsel %vm1570_vm5, %v1554_v51, %v1650_v15  ;;  %1675 = vst [vmem:[%s2987_s21 + $0x20] sm:$0xff] %v1659_v46  ;;  %v1667_v14 = vsel %vm1571_vm6, %v1555_v48, %v1651_v32  ;;  %v1668_v24 = vsel %vm1572_vm7, %v1556_v3, %v1652_v1  ;;  %v4403_v21 = vld [vmem:[#allocation47_spill] sm:$0xff]  ;;  %v4404_v32 = vld [vmem:[#allocation48_spill] sm:$0xff] }
 0x50f   : > { %1676 = vst [vmem:[%s2987_s21 + $0x28] sm:$0xff] %v1660_v11  ;;  %1677 = vst [vmem:[%s2987_s21 + $0x30] sm:$0xff] %v1661_v55  ;;  %v1669_v26 = vsel %vm1573_vm8, %v1557_v31, %v1653_v20  ;;  %v1670_v25 = vsel %vm1574_vm9, %v1558_v7, %v1654_v44  ;;  %v4391_v4 = vsub.f32 %v3297_v40, %v3742_v63  ;;  %v4401_v44 = vld [vmem:[#allocation46_spill] sm:$0xff]  ;;  %v4407_v39 = vld [vmem:[#allocation51_spill] sm:$0xff] }
 0x510   : > { %1678 = vst [vmem:[%s2987_s21 + $0x38] sm:$0xff] %v1662_v29  ;;  %1679 = vst [vmem:[%s2987_s21 + $0x40] sm:$0xff] %v1663_v33  ;;  %v4392_v48 = vsub.f32 %v3567_v30, %v3742_v63  ;;  %v4393_v31 = vsub.f32 %v3764_v47, %v3742_v63  ;;  %v4394_v59 = vsub.f32 %v3301_v58, %v3742_v63  ;;  %v4408_v57 = vld [vmem:[#allocation52_spill] sm:$0xff]  ;;  %v4409_v11 = vld [vmem:[#allocation53_spill] sm:$0xff]  ;;  %v2077_v33 = vpop.permute.xlu0 %2076 }
 0x511   : > { %1680 = vst [vmem:[%s2987_s21 + $0x48] sm:$0xff] %v1664_v37  ;;  %1681 = vst [vmem:[%s2987_s21 + $0x50] sm:$0xff] %v1665_v6  ;;  %v1831_v51 = vmul.f32 %v4391_v4, %v3847_v45  ;;  %v4395_v40 = vsub.f32 %v3767_v62, %v3742_v63  ;;  %v4396_v30 = vsub.f32 %v3770_v0, %v3742_v63  ;;  %v4411_v37 = vld [vmem:[#allocation62_spill] sm:$0xff] }
 0x512   : > { %1682 = vst [vmem:[%s2987_s21 + $0x58] sm:$0xff] %v1666_v13  ;;  %1683 = vst [vmem:[%s2987_s21 + $0x60] sm:$0xff] %v1667_v14  ;;  %v1832_v3 = vmul.f32 %v4392_v48, %v3847_v45  ;;  %v1833_v7 = vmul.f32 %v4393_v31, %v3847_v45  ;;  %v1834_v49 = vmul.f32 %v4394_v59, %v3847_v45  ;;  %v4412_v13 = vld [vmem:[#allocation57_spill] sm:$0xff]  ;;  %v4416_v31 = vld [vmem:[#allocation63_spill] sm:$0xff] }
 0x513   : > { %1684 = vst [vmem:[%s2987_s21 + $0x68] sm:$0xff] %v1668_v24  ;;  %1685 = vst [vmem:[%s2987_s21 + $0x70] sm:$0xff] %v1669_v26  ;;  %v1835_v18 = vmul.f32 %v4395_v40, %v3847_v45  ;;  %v1837_v8 = vmul.f32 %v4396_v30, %v3847_v45  ;;  %v4397_v47 = vsub.f32 %v3318_v19, %v3742_v63  ;;  %v4413_v24 = vld [vmem:[#allocation59_spill] sm:$0xff]  ;;  %v4415_v48 = vld [vmem:[#allocation61_spill] sm:$0xff] }
 0x514   : > { %1686 = vst [vmem:[%s2987_s21 + $0x78] sm:$0xff] %v1670_v25  ;;  %v4398_v58 = vsub.f32 %v3324_v38, %v3742_v63  ;;  %v4399_v62 = vsub.f32 %v3328_v61, %v3742_v63  ;;  %v4400_v0 = vsub.f32 %v3334_v42, %v3742_v63  ;;  %v1911_v28 = vmul.f32 %v4401_v44, %v1831_v51  ;;  %v4405_v38 = vld [vmem:[#allocation8_spill] sm:$0xff]  ;;  %v4410_v42 = vld [vmem:[#allocation55_spill] sm:$0xff]  ;;  %v4033_v51 = vpop.permute.xlu1 %2064  ;;  %v4417_v59 = vld [vmem:[#allocation70_spill] sm:$0xff] }
 0x515   : > { %v1840_v5 = vmul.f32 %v4397_v47, %v3847_v45  ;;  %v1912_v19 = vmul.f32 %v4402_v2, %v1832_v3  ;;  %v1913_v15 = vmul.f32 %v4403_v21, %v1833_v7  ;;  %v1914_v1 = vmul.f32 %v4404_v32, %v1834_v49  ;;  %v4414_v25 = vld [vmem:[#allocation64_spill] sm:$0xff]  ;;  %v4419_v30 = vld [vmem:[#allocation74_spill] sm:$0xff] }
 0x516   : > { %v1842_v54 = vmul.f32 %v4398_v58, %v3847_v45  ;;  %v1844_v53 = vmul.f32 %v4399_v62, %v3847_v45  ;;  %v1846_v10 = vmul.f32 %v4400_v0, %v3847_v45  ;;  %v1915_v20 = vmul.f32 %v4405_v38, %v1835_v18  ;;  %v4418_v40 = vld [vmem:[#allocation72_spill] sm:$0xff]  ;;  %v4421_v58 = vld [vmem:[#allocation73_spill] sm:$0xff] }
 0x517   : > { %v1917_v12 = vmul.f32 %v4406_v60, %v1837_v8  ;;  %v1920_v61 = vmul.f32 %v4407_v39, %v1840_v5  ;;  %v1991_v6 = vadd.f32 %v4411_v37, %v1911_v28  ;;  %v1992_v14 = vadd.f32 %v4412_v13, %v1912_v19  ;;  %v4420_v47 = vld [vmem:[#allocation76_spill] sm:$0xff]  ;;  %v2085_v28 = vpop.permute.xlu0 %2084 }
 0x518   : > { %v1922_v46 = vmul.f32 %v4408_v57, %v1842_v54  ;;  %v1924_v55 = vmul.f32 %v4409_v11, %v1844_v53  ;;  %v1926_v29 = vmul.f32 %v4410_v42, %v1846_v10  ;;  %v1993_v26 = vadd.f32 %v4413_v24, %v1913_v15  ;;  %v4422_v53 = vld [vmem:[#allocation75_spill] sm:$0xff]  ;;  %v4423_v10 = vld [vmem:[#allocation77_spill] sm:$0xff]  ;;  %v4049_v32 = vpop.permute.xlu1 %2072 }
 0x519   : > { %v1994_v4 = vadd.f32 %v4414_v25, %v1914_v1  ;;  %v1995_v3 = vadd.f32 %v4415_v48, %v1915_v20  ;;  %v1997_v7 = vadd.f32 %v4416_v31, %v1917_v12  ;;  %v2000_v49 = vadd.f32 %v4417_v59, %v1920_v61  ;;  %v4431_v24 = vld [vmem:[#allocation25_spill] sm:$0xff]  ;;  %v4433_v25 = vld [vmem:[#allocation26_spill] sm:$0xff] }
 0x51a   : > { %v2002_v18 = vadd.f32 %v4418_v40, %v1922_v46  ;;  %v2004_v8 = vadd.f32 %v4419_v30, %v1924_v55  ;;  %v2006_v5 = vadd.f32 %v4420_v47, %v1926_v29  ;;  %vm2007_vm10 = vcmp.ge.f32.partialorder %v1991_v6, 0.0  ;;  %v4434_v48 = vld [vmem:[#allocation49_spill] sm:$0xff]  ;;  %v4440_v47 = vld [vmem:[#allocation80_spill] sm:$0xff] }
 0x51b   : > { %vm2008_vm11 = vcmp.ge.f32.partialorder %v1992_v14, 0.0  ;;  %vm2009_vm12 = vcmp.ge.f32.partialorder %v1993_v26, 0.0  ;;  %vm2010_vm13 = vcmp.ge.f32.partialorder %v1994_v4, 0.0  ;;  %vm2011_vm14 = vcmp.ge.f32.partialorder %v1995_v3, 0.0 }
 0x51c   : > { %vm2013_vm15 = vcmp.ge.f32.partialorder %v1997_v7, 0.0  ;;  %vm2016_vm0 = vcmp.ge.f32.partialorder %v2000_v49, 0.0  ;;  %vm2018_vm1 = vcmp.ge.f32.partialorder %v2002_v18, 0.0  ;;  %vm2020_vm2 = vcmp.ge.f32.partialorder %v2004_v8, 0.0 }
 0x51d   : > { %vm2022_vm3 = vcmp.ge.f32.partialorder %v2006_v5, 0.0  ;;  %v2087_v54 = vmul.f32 %v4421_v58, %v1991_v6  ;;  %v2088_v62 = vmul.f32 %v3855_v27, %v1992_v14  ;;  %v2089_v0 = vmul.f32 %v4422_v53, %v1993_v26  ;;  %v4441_v58 = vld [vmem:[#allocation27_spill] sm:$0xff] }
 0x51e   : > { %v2090_v44 = vmul.f32 %v4423_v10, %v1994_v4  ;;  %v2091_v2 = vmul.f32 %v3887_v36, %v1995_v3  ;;  %v2093_v19 = vmul.f32 %v3915_v50, %v1997_v7  ;;  %v2096_v21 = vmul.f32 %v3927_v52, %v2000_v49 }
 0x51f   : > { %v2098_v15 = vmul.f32 %v3963_v17, %v2002_v18  ;;  %v2100_v27 = vmul.f32 %v2077_v33, %v2004_v8  ;;  %v2102_v1 = vmul.f32 %v2085_v28, %v2006_v5  ;;  %v2103_v38 = vsel %vm2007_vm10, %v1991_v6, %v2087_v54  ;;  %v4445_v28 = vld [vmem:[#allocation67_spill] sm:$0xff] }
 0x520   : > { %v2104_v20 = vsel %vm2008_vm11, %v1992_v14, %v2088_v62  ;;  %v2105_v36 = vsel %vm2009_vm12, %v1993_v26, %v2089_v0  ;;  %v2106_v50 = vsel %vm2010_vm13, %v1994_v4, %v2090_v44  ;;  %v2107_v52 = vsel %vm2011_vm14, %v1995_v3, %v2091_v2  ;;  %2119 = vst [vmem:[%s2987_s21 + $0x80] sm:$0xff] %v2103_v38  ;;  %v4435_v3 = vld [vmem:[#allocation50_spill] sm:$0xff]  ;;  %v4443_v62 = vld [vmem:[#allocation68_spill] sm:$0xff]  ;;  %v4444_v0 = vld [vmem:[#allocation65_spill] sm:$0xff]  ;;  %v2183_v44 = vpop.permute.xlu0 %2182 }
 0x521   : > { %v2109_v17 = vsel %vm2013_vm15, %v1997_v7, %v2093_v19  ;;  %2120 = vst [vmem:[%s2987_s21 + $0x88] sm:$0xff] %v2104_v20  ;;  %v2112_v60 = vsel %vm2016_vm0, %v2000_v49, %v2096_v21  ;;  %v2114_v12 = vsel %vm2018_vm1, %v2002_v18, %v2098_v15  ;;  %v2116_v39 = vsel %vm2020_vm2, %v2004_v8, %v2100_v27  ;;  %v4436_v7 = vld [vmem:[#allocation10_spill] sm:$0xff]  ;;  %v4437_v49 = vld [vmem:[#allocation11_spill] sm:$0xff]  ;;  %v4438_v18 = vld [vmem:[#allocation12_spill] sm:$0xff] }
 0x522   : > { %v2118_v61 = vsel %vm2022_vm3, %v2006_v5, %v2102_v1  ;;  %2121 = vst [vmem:[%s2987_s21 + $0x90] sm:$0xff] %v2105_v36  ;;  %2122 = vst [vmem:[%s2987_s21 + $0x98] sm:$0xff] %v2106_v50  ;;  %v4424_v57 = vsub.f32 %v3725_v56, %v3742_v63  ;;  %v4425_v11 = vsub.f32 %v3304_v16, %v3742_v63  ;;  %v4446_v19 = vld [vmem:[#allocation69_spill] sm:$0xff]  ;;  %v4447_v15 = vld [vmem:[#allocation71_spill] sm:$0xff] }
 0x523   : > { %2123 = vst [vmem:[%s2987_s21 + $0xa0] sm:$0xff] %v2107_v52  ;;  %2125 = vst [vmem:[%s2987_s21 + $0xb0] sm:$0xff] %v2109_v17  ;;  %v4426_v42 = vsub.f32 %v3313_v35, %v3742_v63  ;;  %v4427_v33 = vsub.f32 %v3773_v41, %v3742_v63  ;;  %v4428_v56 = vsub.f32 %v3779_v34, %v3742_v63  ;;  %v4448_v1 = vld [vmem:[#allocation78_spill] sm:$0xff]  ;;  %v4449_v50 = vld [vmem:[#allocation28_spill] sm:$0xff] }
 0x524   : > { %2128 = vst [vmem:[%s2987_s21 + $0xc8] sm:$0xff] %v2112_v60  ;;  %2130 = vst [vmem:[%s2987_s21 + $0xd8] sm:$0xff] %v2114_v12  ;;  %v2154_v46 = vmul.f32 %v4424_v57, %v3847_v45  ;;  %v1836_v55 = vmul.f32 %v4425_v11, %v3847_v45  ;;  %v4429_v16 = vsub.f32 %v3782_v43, %v3742_v63  ;;  %v2081_v43 = vpop.permute.xlu1 %2080 }
 0x525   : > { %2132 = vst [vmem:[%s2987_s21 + $0xe8] sm:$0xff] %v2116_v39  ;;  %2134 = vst [vmem:[%s2987_s21 + $0xf8] sm:$0xff] %v2118_v61  ;;  %v1838_v29 = vmul.f32 %v4426_v42, %v3847_v45  ;;  %v1839_v37 = vmul.f32 %v4427_v33, %v3847_v45  ;;  %v1841_v6 = vmul.f32 %v4428_v56, %v3847_v45 }
 0x526   : > { %v1843_v13 = vmul.f32 %v4429_v16, %v3847_v45  ;;  %v4430_v35 = vsub.f32 %v3785_v23, %v3742_v63  ;;  %v4432_v41 = vsub.f32 %v4431_v24, %v3742_v63  ;;  %v2164_v4 = vmul.f32 %v4433_v25, %v2154_v46  ;;  %v4439_v23 = vld [vmem:[#allocation13_spill] sm:$0xff] }
 0x527   : > { %v1916_v34 = vmul.f32 %v4434_v48, %v1836_v55  ;;  %v1918_v31 = vmul.f32 %v4435_v3, %v1838_v29  ;;  %v1919_v59 = vmul.f32 %v4436_v7, %v1839_v37  ;;  %v1921_v40 = vmul.f32 %v4437_v49, %v1841_v6 }
 0x528   : > { %v1845_v14 = vmul.f32 %v4430_v35, %v3847_v45  ;;  %v2153_v26 = vmul.f32 %v4432_v41, %v3847_v45  ;;  %v1923_v30 = vmul.f32 %v4438_v18, %v1843_v13  ;;  %v2174_v63 = vadd.f32 %v4441_v58, %v2164_v4  ;;  %v4442_v45 = vld [vmem:[#allocation66_spill] sm:$0xff]  ;;  %v2179_v61 = vpop.permute.xlu1 %2178 }
 0x529   : > { %v1996_v54 = vadd.f32 %v4442_v45, %v1916_v34  ;;  %v1998_v53 = vadd.f32 %v4443_v62, %v1918_v31  ;;  %v1999_v10 = vadd.f32 %v4444_v0, %v1919_v59  ;;  %v2001_v2 = vadd.f32 %v4445_v28, %v1921_v40 }
 0x52a   : > { %v1925_v8 = vmul.f32 %v4439_v23, %v1845_v14  ;;  %v2163_v5 = vmul.f32 %v4440_v47, %v2153_v26  ;;  %v2003_v21 = vadd.f32 %v4446_v19, %v1923_v30  ;;  %vm2176_vm4 = vcmp.ge.f32.partialorder %v2174_v63, 0.0 }
 0x52b   : > { %v2186_v20 = vmul.f32 %v2183_v44, %v2174_v63  ;;  %vm2012_vm5 = vcmp.ge.f32.partialorder %v1996_v54, 0.0  ;;  %v2092_v36 = vmul.f32 %v3921_v22, %v1996_v54  ;;  %vm2014_vm6 = vcmp.ge.f32.partialorder %v1998_v53, 0.0 }
 0x52c   : > { %v2005_v27 = vadd.f32 %v4447_v15, %v1925_v8  ;;  %v2173_v38 = vadd.f32 %v4448_v1, %v2163_v5  ;;  %v2094_v52 = vmul.f32 %v4449_v50, %v1998_v53  ;;  %vm2015_vm7 = vcmp.ge.f32.partialorder %v1999_v10, 0.0 }
 0x52d   : > { %v2095_v17 = vmul.f32 %v3973_v9, %v1999_v10  ;;  %v2188_v60 = vsel %vm2176_vm4, %v2174_v63, %v2186_v20  ;;  %v2108_v12 = vsel %vm2012_vm5, %v1996_v54, %v2092_v36  ;;  %vm2017_vm8 = vcmp.ge.f32.partialorder %v2001_v2, 0.0 }
 0x52e   : > { %v2097_v39 = vmul.f32 %v4033_v51, %v2001_v2  ;;  %2190 = vst [vmem:[%s2987_s21 + $0x108] sm:$0xff] %v2188_v60  ;;  %2124 = vst [vmem:[%s2987_s21 + $0xa8] sm:$0xff] %v2108_v12  ;;  %v2110_v57 = vsel %vm2014_vm6, %v1998_v53, %v2094_v52  ;;  %v2099_v46 = vmul.f32 %v4049_v32, %v2003_v21  ;;  %vm2019_vm9 = vcmp.ge.f32.partialorder %v2003_v21, 0.0 }
 0x52f   : > { %v2111_v22 = vsel %vm2015_vm7, %v1999_v10, %v2095_v17  ;;  %2126 = vst [vmem:[%s2987_s21 + $0xb8] sm:$0xff] %v2110_v57  ;;  %v2101_v9 = vmul.f32 %v2081_v43, %v2005_v27  ;;  %vm2021_vm10 = vcmp.ge.f32.partialorder %v2005_v27, 0.0  ;;  %v2185_v42 = vmul.f32 %v2179_v61, %v2173_v38 }
 0x530   : > { %2127 = vst [vmem:[%s2987_s21 + $0xc0] sm:$0xff] %v2111_v22  ;;  %v2113_v11 = vsel %vm2017_vm8, %v2001_v2, %v2097_v39  ;;  %v2115_v55 = vsel %vm2019_vm9, %v2003_v21, %v2099_v46  ;;  %vm2175_vm11 = vcmp.ge.f32.partialorder %v2173_v38, 0.0 }
 0x531   : > { %2129 = vst [vmem:[%s2987_s21 + $0xd0] sm:$0xff] %v2113_v11  ;;  %2131 = vst [vmem:[%s2987_s21 + $0xe0] sm:$0xff] %v2115_v55  ;;  %v2117_v51 = vsel %vm2021_vm10, %v2005_v27, %v2101_v9  ;;  %v2187_v29 = vsel %vm2175_vm11, %v2173_v38, %v2185_v42 }
 0x532   : > { %2133 = vst [vmem:[%s2987_s21 + $0xf0] sm:$0xff] %v2117_v51  ;;  %2189 = vst [vmem:[%s2987_s21 + $0x100] sm:$0xff] %v2187_v29 }
 0x533 PF: > { %s13_s14 = sadd.s32 1, %s2546_s14   ;;  %s4450_s12 = smov %s2542_s13 }
 0x534   : > { %p10_p5 = scmp.ge.s32.totalorder %s13_s14, 4   ;;  %s4451_s13 = smov %s4453_s15 }
 0x536   :  { %12 = sbr.rel (!%p10_p5) target bundleno = 2 (0x2), region = 66 }

</bundles_post_ra>
